<compile_context>
chip_gen: v5e
topology: v5e:2x2
jax: 0.10.0
libtpu: 0.0.40
codegen_flags: <defaults>
</compile_context>

<pallas_src>
import jax
import jax.numpy as jnp
from jax import lax
from jax.experimental import pallas as pl
from jax.experimental.pallas import tpu as pltpu


def _round_up(x, m):
    return ((x + m - 1) // m) * m


def _cdiv(a, b):
    return -(-a // b)


_SUBLANE = {4: 8, 2: 16, 1: 32}


def _block_bytes(shape, dtype):
    """VMEM footprint of one block, accounting for (sublane, lane) tiling."""
    item = jnp.dtype(dtype).itemsize
    s = [int(d) for d in shape]
    if len(s) >= 1:
        s[-1] = _round_up(s[-1], 128)
    if len(s) >= 2:
        s[-2] = _round_up(s[-2], _SUBLANE.get(item, 8))
    n = 1
    for d in s:
        n *= d
    return n * item


def _vmem_capacity_bytes():
    try:
        return int(pltpu.get_tpu_info().vmem_capacity_bytes)
    except Exception:
        return 64 * 1024 * 1024  # conservative (v7x-sized) fallback


# ---------------------------------------------------------------------------
# Path A kernel: in-kernel im2col (stride 1).  One grid step = one batch item
# (x one cout slice).  Input block is the whole padded image; taps are static
# slices; per-tap matmuls accumulate in f32; fused BN/residual/ReLU epilogue.
# ---------------------------------------------------------------------------
def _make_fused_kernel(kh, kw, OH, OW, residual, use_act):
    def kernel(x_ref, w_ref, sc_ref, sh_ref, *rest):
        if residual:
            r_ref, o_ref = rest
        else:
            (o_ref,) = rest

        x = x_ref[0]                       # (Hp, Wp, cin)
        cin = x.shape[-1]
        acc = None
        for dy in range(kh):
            for dx in range(kw):
                win = x[dy:dy + OH, dx:dx + OW, :]          # (OH, OW, cin)
                lhs = win.reshape(OH * OW, cin)
                part = jnp.dot(lhs, w_ref[dy * kw + dx],
                               preferred_element_type=jnp.float32)
                acc = part if acc is None else acc + part

        out = acc * sc_ref[...] + sh_ref[...]
        if residual:
            out = out + r_ref[0].reshape(OH * OW, -1).astype(jnp.float32)
        if use_act:
            out = jnp.maximum(out, 0.0)
        o_ref[...] = out.reshape(o_ref.shape).astype(o_ref.dtype)

    return kernel


# ---------------------------------------------------------------------------
# Path B kernel: tiled (patches @ W) matmul.  Direct write on the first K step
# (no zero + read-modify-write); fused epilogue on the last K step.
# ---------------------------------------------------------------------------
def _make_tiled_kernel(residual, use_act, multi_k):
    def epilogue(acc_f32, s_ref, b_ref, r_ref, o_ref):
        out = acc_f32 * s_ref[...] + b_ref[...]
        if residual:
            out = out + r_ref[...].astype(jnp.float32)
        if use_act:
            out = jnp.maximum(out, 0.0)
        o_ref[...] = out.astype(o_ref.dtype)

    def kernel(p_ref, w_ref, s_ref, b_ref, *rest):
        if residual:
            r_ref = rest[0]
            rest = rest[1:]
        else:
            r_ref = None
        o_ref = rest[0]

        part = jnp.dot(p_ref[...], w_ref[...],
                       preferred_element_type=jnp.float32)

        if multi_k:
            acc_ref = rest[1]
            k = pl.program_id(2)

            @pl.when(k == 0)
            def _():
                acc_ref[...] = part

            @pl.when(k > 0)
            def _():
                acc_ref[...] += part

            @pl.when(k == pl.num_programs(2) - 1)
            def _():
                epilogue(acc_ref[...], s_ref, b_ref, r_ref, o_ref)
        else:
            epilogue(part, s_ref, b_ref, r_ref, o_ref)

    return kernel


# ---------------------------------------------------------------------------
# Wrapper
# ---------------------------------------------------------------------------
def conv2d_bn_act(
    x,              # (N, cin, H, W)  NCHW, like PyTorch
    weight,         # (cout, cin, kh, kw)  OIHW
    conv_bias,      # (cout,)
    gamma,          # (cout,)  BN weight
    beta,           # (cout,)  BN bias
    run_mean,       # (cout,)  BN running mean
    run_var,        # (cout,)  BN running var
    *,
    stride=1,
    padding=1,
    residual=False,
    use_act=True,
    eps=1e-5,
    compute_dtype=jnp.bfloat16,   # MXU operand dtype (jnp.float32 for high precision)
    force_tiled=False,            # force Path B (for testing)
    tile_m=None, tile_n=None, tile_k=None,
):
    N, cin, H, W = x.shape
    cout, _, kh, kw = weight.shape
    OH = (H + 2 * padding - kh) // stride + 1
    OW = (W + 2 * padding - kw) // stride + 1
    M = N * OH * OW
    K = cin * kh * kw
    out_dtype = x.dtype
    out_b = jnp.dtype(out_dtype).itemsize
    cdt = jnp.dtype(compute_dtype)

    if residual:
        assert cin == cout and OH == H and OW == W, \
            "residual requires a shape-preserving conv"

    cap = _vmem_capacity_bytes()
    # generation-aware scoped-VMEM limit (~96 MiB on v5e/v6e, ~48 MiB on v7x)
    vmem_limit = int(0.75 * cap)

    # ---- fold conv bias + eval-mode BatchNorm into a single f32 scale/shift
    scale = (gamma / jnp.sqrt(run_var + eps)).astype(jnp.float32)
    shift = ((conv_bias - run_mean) * scale + beta).astype(jnp.float32)
    Cp = _round_up(cout, 128)
    scale_p = jnp.pad(scale, (0, Cp - cout)).reshape(1, Cp)
    shift_p = jnp.pad(shift, (0, Cp - cout)).reshape(1, Cp)

    # ---- NHWC + compute dtype, spatially padded so every tap window is in bounds
    x_nhwc = jnp.transpose(x, (0, 2, 3, 1))                  # (N, H, W, cin)
    Hp = (kh - 1) + stride * OH
    Wp = (kw - 1) + stride * OW
    xp = jnp.pad(
        x_nhwc.astype(cdt),
        ((0, 0), (padding, Hp - H - padding), (padding, Wp - W - padding), (0, 0)),
    )

    # ---- weights: OIHW -> (kh*kw, cin, Cp), compute dtype, cout zero-padded
    w_taps = jnp.transpose(weight, (2, 3, 1, 0)).reshape(kh * kw, cin, cout)
    w_taps = jnp.pad(w_taps.astype(cdt), ((0, 0), (0, 0), (0, Cp - cout)))

    # =======================================================================
    # Path A: fused in-kernel im2col (stride 1)
    # =======================================================================
    n_j = 2 if (N == 1 and Cp % 256 == 0 and Cp >= 256) else 1   # keep 2 TCs busy
    tn_a = Cp // n_j
    fused_est = (
        2 * _block_bytes((1, Hp, Wp, cin), cdt)                  # input (dbl buf)
        + _block_bytes((1, Hp, Wp, cin), cdt)                    # loaded copy
        + 2 * _block_bytes((kh * kw, cin, tn_a), cdt)            # weights
        + 4 * _block_bytes((1, tn_a), jnp.float32)               # scale / shift
        + 2 * _block_bytes((1, OH, OW, tn_a), out_dtype)         # output
        + (2 * _block_bytes((1, OH, OW, tn_a), cdt) if residual else 0)
        + _block_bytes((OH * OW, tn_a), jnp.float32)             # f32 accumulator
        + 6 * _block_bytes((OH * OW, max(cin, 1)), cdt)          # tap temporaries
        + (2 << 20)
    )
    use_fused = (stride == 1) and (not force_tiled) and fused_est <= int(0.5 * vmem_limit)

    if use_fused:
        inputs = [xp, w_taps, scale_p, shift_p]
        in_specs = [
            pl.BlockSpec((1, Hp, Wp, cin), lambda n, j: (n, 0, 0, 0)),
            pl.BlockSpec((kh * kw, cin, tn_a), lambda n, j: (0, 0, j)),
            pl.BlockSpec((1, tn_a), lambda n, j: (0, j)),
            pl.BlockSpec((1, tn_a), lambda n, j: (0, j)),
        ]
        if residual:
            res = jnp.pad(x_nhwc.astype(cdt),
                          ((0, 0), (0, 0), (0, 0), (0, Cp - cout)))
            inputs.append(res)
            in_specs.append(
                pl.BlockSpec((1, OH, OW, tn_a), lambda n, j: (n, 0, 0, j)))

        cost = pl.CostEstimate(
            flops=int(2 * M * K * Cp),
            transcendentals=0,
            bytes_accessed=int(
                xp.size * cdt.itemsize
                + N * w_taps.size * cdt.itemsize
                + M * Cp * out_b
                + (M * Cp * cdt.itemsize if residual else 0)),
        )

        out = pl.pallas_call(
            _make_fused_kernel(kh, kw, OH, OW, residual, use_act),
            out_shape=jax.ShapeDtypeStruct((N, OH, OW, Cp), out_dtype),
            grid_spec=pltpu.PrefetchScalarGridSpec(
                num_scalar_prefetch=0,
                grid=(N, n_j),
                in_specs=in_specs,
                out_specs=pl.BlockSpec((1, OH, OW, tn_a),
                                       lambda n, j: (n, 0, 0, j)),
            ),
            compiler_params=pltpu.CompilerParams(
                dimension_semantics=("parallel", "parallel"),
                vmem_limit_bytes=vmem_limit),
            cost_estimate=cost,
        )(*inputs)
        out = out[..., :cout]
        return jnp.transpose(out, (0, 3, 1, 2))

    # =======================================================================
    # Path B: tiled im2col matmul (fallback)
    # =======================================================================
    budget = int(0.5 * vmem_limit)

    # patch matrix (M, K) from the already-padded NHWC input (compute dtype)
    cols = []
    for dy in range(kh):
        for dx in range(kw):
            cols.append(xp[:, dy:dy + stride * OH:stride,
                           dx:dx + stride * OW:stride, :])
    patches = jnp.stack(cols, axis=3).reshape(M, K)

    # cout tile: keep all of cout resident when it is small so that the patch
    # matrix (the dominant stream) is read from HBM exactly once.
    if tile_n is not None:
        tn = tile_n
    elif Cp <= 1024:
        tn = Cp
    else:
        tn = 512 if Cp % 512 == 0 else (256 if Cp % 256 == 0 else 128)
    if Cp % tn:
        tn = 128

    def tiled_bytes(tm_, tk_, multi_k_):
        b = 2 * (_block_bytes((tm_, tk_), cdt) + _block_bytes((tk_, tn), cdt)
                 + _block_bytes((tm_, tn), out_dtype))
        b += 4 * _block_bytes((1, tn), jnp.float32)
        if residual:
            b += 2 * _block_bytes((tm_, tn), cdt)
        if multi_k_:
            b += _block_bytes((tm_, tn), jnp.float32)
        return b + (1 << 20)

    # K tiling: a single unpadded-K step when it fits VMEM (full-dim blocks are
    # exempt from the 128-lane rule); otherwise dividing 128-multiple K tiles
    # with minimal padding (no silent Kp blow-up).
    kp128 = _round_up(K, 128)
    if tile_k is not None:
        if tile_k >= K:
            tk, Kp, n_k = K, K, 1
        else:
            tgt = max(128, (tile_k // 128) * 128)
            n_k = _cdiv(kp128, tgt)
            tk = 128 * _cdiv(kp128 // 128, n_k)
            Kp = tk * n_k
    elif K <= 128 or tiled_bytes(256, K, False) <= budget:
        tk, Kp, n_k = K, K, 1
    else:
        n_k = _cdiv(kp128, 1024)
        tk = 128 * _cdiv(kp128 // 128, n_k)
        Kp = tk * n_k
    multi_k = n_k > 1

    # M tile: largest that fits the VMEM budget, then shrink (if needed) so the
    # parallel grid has at least two blocks for megacore / dual-TC chips.
    if tile_m is not None:
        tm = tile_m
    else:
        tm = 128
        for cand in (2048, 1024, 512, 256, 128):
            if tiled_bytes(cand, tk, multi_k) <= budget:
                tm = cand
                break
        tm = min(tm, _round_up(M, 128))
        while tm > 128 and _cdiv(M, tm) * (Cp // tn) < 2:
            tm = max(128, ((tm // 2) // 128) * 128)
    tm = max(128, min(tm, _round_up(M, 128)))
    Mp = _round_up(M, tm)

    patches = jnp.pad(patches, ((0, Mp - M), (0, Kp - K)))
    w2 = jnp.pad(w_taps.reshape(K, Cp), ((0, Kp - K), (0, 0)))

    inputs = [patches, w2, scale_p, shift_p]
    in_specs = [
        pl.BlockSpec((tm, tk), lambda i, j, k: (i, k)),
        pl.BlockSpec((tk, tn), lambda i, j, k: (k, j)),
        pl.BlockSpec((1, tn), lambda i, j, k: (0, j)),
        pl.BlockSpec((1, tn), lambda i, j, k: (0, j)),
    ]
    if residual:
        res = x_nhwc.reshape(M, cout).astype(cdt)
        res = jnp.pad(res, ((0, Mp - M), (0, Cp - cout)))
        inputs.append(res)
        in_specs.append(pl.BlockSpec((tm, tn), lambda i, j, k: (i, j)))

    n_i, n_jj = Mp // tm, Cp // tn
    scratch = [pltpu.VMEM((tm, tn), jnp.float32)] if multi_k else []

    cost = pl.CostEstimate(
        flops=int(2 * Mp * Kp * Cp),
        transcendentals=0,
        bytes_accessed=int(
            Mp * Kp * cdt.itemsize * n_jj
            + Kp * Cp * cdt.itemsize * n_i
            + Mp * Cp * out_b
            + (Mp * Cp * cdt.itemsize if residual else 0)),
    )

    out = pl.pallas_call(
        _make_tiled_kernel(residual, use_act, multi_k),
        out_shape=jax.ShapeDtypeStruct((Mp, Cp), out_dtype),
        grid_spec=pltpu.PrefetchScalarGridSpec(
            num_scalar_prefetch=0,
            grid=(n_i, n_jj, n_k),
            in_specs=in_specs,
            out_specs=pl.BlockSpec((tm, tn), lambda i, j, k: (i, j)),
            scratch_shapes=scratch,
        ),
        compiler_params=pltpu.CompilerParams(
            dimension_semantics=("parallel", "parallel", "arbitrary"),
            vmem_limit_bytes=vmem_limit),
        cost_estimate=cost,
    )(*inputs)

    out = out[:M, :cout].reshape(N, OH, OW, cout)
    return jnp.transpose(out, (0, 3, 1, 2))


# ---------------------------------------------------------------------------
# Pure-JAX f32 reference (for correctness check)
# ---------------------------------------------------------------------------
def _reference(x, weight, conv_bias, gamma, beta, rm, rv, *, stride, padding,
               residual, use_act, eps=1e-5):
    out = lax.conv_general_dilated(
        x, weight, (stride, stride),
        [(padding, padding), (padding, padding)],
        dimension_numbers=("NCHW", "OIHW", "NCHW"),
    )
    out = out + conv_bias.reshape(1, -1, 1, 1)
    out = (out - rm.reshape(1, -1, 1, 1)) / jnp.sqrt(rv.reshape(1, -1, 1, 1) + eps)
    out = out * gamma.reshape(1, -1, 1, 1) + beta.reshape(1, -1, 1, 1)
    if residual:
        out = out + x
    if use_act:
        out = jnp.maximum(out, 0.0)
    return out


def _run_case(key, *, N, cin, H, W, cout, kh, kw, stride, padding,
              residual, use_act, tol=5e-2, **extra):
    ks = jax.random.split(key, 7)
    x = jax.random.normal(ks[0], (N, cin, H, W), dtype=jnp.float32)
    weight = jax.random.normal(ks[1], (cout, cin, kh, kw), dtype=jnp.float32) * 0.1
    conv_bias = jax.random.normal(ks[2], (cout,), dtype=jnp.float32) * 0.1
    gamma = jax.random.normal(ks[3], (cout,), dtype=jnp.float32) * 0.1 + 1.0
    beta = jax.random.normal(ks[4], (cout,), dtype=jnp.float32) * 0.1
    run_mean = jax.random.normal(ks[5], (cout,), dtype=jnp.float32) * 0.1
    run_var = jax.random.uniform(ks[6], (cout,), dtype=jnp.float32,
                                 minval=0.5, maxval=1.5)

    out = conv2d_bn_act(
        x, weight, conv_bias, gamma, beta, run_mean, run_var,
        stride=stride, padding=padding, residual=residual, use_act=use_act,
        **extra,
    )
    out = jax.block_until_ready(out)

    ref = _reference(
        x, weight, conv_bias, gamma, beta, run_mean, run_var,
        stride=stride, padding=padding, residual=residual, use_act=use_act,
    )
    assert out.shape == ref.shape, (out.shape, ref.shape)
    err = float(jnp.max(jnp.abs(out - ref)))
    # bf16 MXU operands by default -> loose tolerance vs the f32 reference.
    assert jnp.allclose(out, ref, rtol=tol, atol=tol), err
    return err


if __name__ == "__main__":
    key = jax.random.PRNGKey(0)
    k1, k2, k3 = jax.random.split(key, 3)

    # Case 1: 3x3 / stride 1 / 'same', residual + ReLU -> fused in-kernel im2col path.
    _run_case(k1, N=2, cin=4, H=16, W=16, cout=4, kh=3, kw=3,
              stride=1, padding=1, residual=True, use_act=True)

    # Case 2: 3x3 / stride 2, no residual, no activation -> tiled path (stride != 1).
    _run_case(k2, N=2, cin=4, H=16, W=16, cout=8, kh=3, kw=3,
              stride=2, padding=1, residual=False, use_act=False)

    # Case 3: force the tiled path with a multi-step K reduction, a multi-block
    # M grid and M/K padding edges (accumulator init/finalize exercised);
    # f32 compute keeps the check tight-ish.
    _run_case(k3, N=1, cin=32, H=20, W=20, cout=32, kh=3, kw=3,
              stride=1, padding=1, residual=True, use_act=True,
              force_tiled=True, tile_m=256, tile_k=128,
              compute_dtype=jnp.float32, tol=5e-2)

    print("KERNEL_OK")
</pallas_src>

<mosaic_0001>
module attributes {stable_mosaic.version = 11 : i64} {
  func.func @kernel(%arg0: i32, %arg1: i32, %arg2: memref<1x18x18x4xbf16, #tpu.memory_space<vmem>>, %arg3: memref<9x4x128xbf16, #tpu.memory_space<vmem>>, %arg4: memref<1x128xf32, #tpu.memory_space<vmem>>, %arg5: memref<1x128xf32, #tpu.memory_space<vmem>>, %arg6: memref<1x16x16x128xbf16, #tpu.memory_space<vmem>>, %arg7: memref<1x16x16x128xf32, #tpu.memory_space<vmem>>) attributes {dimension_semantics = [#tpu.dimension_semantics<parallel>, #tpu.dimension_semantics<parallel>], iteration_bounds = array<i64: 2, 1>, scalar_prefetch = 0 : i64, scratch_operands = 0 : i64, tpu.core_type = #tpu.core_type<tc>, window_params = [{transform_indices = @transform_0, window_bounds = array<i64: 1, 18, 18, 4>}, {transform_indices = @transform_1, window_bounds = array<i64: 9, 4, 128>}, {transform_indices = @transform_2, window_bounds = array<i64: 1, 128>}, {transform_indices = @transform_3, window_bounds = array<i64: 1, 128>}, {transform_indices = @transform_4, window_bounds = array<i64: 1, 16, 16, 128>}, {transform_indices = @transform_5, window_bounds = array<i64: 1, 16, 16, 128>}]} {
    %c0 = arith.constant 0 : index
    %c0_0 = arith.constant 0 : index
    %c0_1 = arith.constant 0 : index
    %c0_2 = arith.constant 0 : index
    %0 = vector.load %arg2[%c0, %c0_0, %c0_1, %c0_2] : memref<1x18x18x4xbf16, #tpu.memory_space<vmem>>, vector<1x18x18x4xbf16>
    %1 = vector.shape_cast %0 : vector<1x18x18x4xbf16> to vector<18x18x4xbf16>
    %2 = vector.extract_strided_slice %1 {offsets = [0, 0, 0], sizes = [16, 16, 4], strides = [1, 1, 1]} : vector<18x18x4xbf16> to vector<16x16x4xbf16>
    %3 = vector.shape_cast %2 : vector<16x16x4xbf16> to vector<256x4xbf16>
    %c0_3 = arith.constant 0 : index
    %c0_4 = arith.constant 0 : index
    %c0_5 = arith.constant 0 : index
    %4 = vector.load %arg3[%c0_3, %c0_4, %c0_5] : memref<9x4x128xbf16, #tpu.memory_space<vmem>>, vector<1x4x128xbf16>
    %5 = vector.shape_cast %4 : vector<1x4x128xbf16> to vector<4x128xbf16>
    %cst = arith.constant dense<0.000000e+00> : vector<256x128xf32>
    %6 = tpu.matmul %3, %5, %cst {dimension_numbers = #tpu.dot_dimension_numbers<[1], [0], [0], [1], [0, 0, 1, 1], [], []>} : vector<256x4xbf16>, vector<4x128xbf16>, vector<256x128xf32> -> vector<256x128xf32>
    %7 = vector.extract_strided_slice %1 {offsets = [0, 1, 0], sizes = [16, 16, 4], strides = [1, 1, 1]} : vector<18x18x4xbf16> to vector<16x16x4xbf16>
    %8 = vector.shape_cast %7 : vector<16x16x4xbf16> to vector<256x4xbf16>
    %c1 = arith.constant 1 : index
    %c0_6 = arith.constant 0 : index
    %c0_7 = arith.constant 0 : index
    %9 = vector.load %arg3[%c1, %c0_6, %c0_7] : memref<9x4x128xbf16, #tpu.memory_space<vmem>>, vector<1x4x128xbf16>
    %10 = vector.shape_cast %9 : vector<1x4x128xbf16> to vector<4x128xbf16>
    %cst_8 = arith.constant dense<0.000000e+00> : vector<256x128xf32>
    %11 = tpu.matmul %8, %10, %cst_8 {dimension_numbers = #tpu.dot_dimension_numbers<[1], [0], [0], [1], [0, 0, 1, 1], [], []>} : vector<256x4xbf16>, vector<4x128xbf16>, vector<256x128xf32> -> vector<256x128xf32>
    %12 = arith.addf %6, %11 : vector<256x128xf32>
    %13 = vector.extract_strided_slice %1 {offsets = [0, 2, 0], sizes = [16, 16, 4], strides = [1, 1, 1]} : vector<18x18x4xbf16> to vector<16x16x4xbf16>
    %14 = vector.shape_cast %13 : vector<16x16x4xbf16> to vector<256x4xbf16>
    %c2 = arith.constant 2 : index
    %c0_9 = arith.constant 0 : index
    %c0_10 = arith.constant 0 : index
    %15 = vector.load %arg3[%c2, %c0_9, %c0_10] : memref<9x4x128xbf16, #tpu.memory_space<vmem>>, vector<1x4x128xbf16>
    %16 = vector.shape_cast %15 : vector<1x4x128xbf16> to vector<4x128xbf16>
    %cst_11 = arith.constant dense<0.000000e+00> : vector<256x128xf32>
    %17 = tpu.matmul %14, %16, %cst_11 {dimension_numbers = #tpu.dot_dimension_numbers<[1], [0], [0], [1], [0, 0, 1, 1], [], []>} : vector<256x4xbf16>, vector<4x128xbf16>, vector<256x128xf32> -> vector<256x128xf32>
    %18 = arith.addf %12, %17 : vector<256x128xf32>
    %19 = vector.extract_strided_slice %1 {offsets = [1, 0, 0], sizes = [16, 16, 4], strides = [1, 1, 1]} : vector<18x18x4xbf16> to vector<16x16x4xbf16>
    %20 = vector.shape_cast %19 : vector<16x16x4xbf16> to vector<256x4xbf16>
    %c3 = arith.constant 3 : index
    %c0_12 = arith.constant 0 : index
    %c0_13 = arith.constant 0 : index
    %21 = vector.load %arg3[%c3, %c0_12, %c0_13] : memref<9x4x128xbf16, #tpu.memory_space<vmem>>, vector<1x4x128xbf16>
    %22 = vector.shape_cast %21 : vector<1x4x128xbf16> to vector<4x128xbf16>
    %cst_14 = arith.constant dense<0.000000e+00> : vector<256x128xf32>
    %23 = tpu.matmul %20, %22, %cst_14 {dimension_numbers = #tpu.dot_dimension_numbers<[1], [0], [0], [1], [0, 0, 1, 1], [], []>} : vector<256x4xbf16>, vector<4x128xbf16>, vector<256x128xf32> -> vector<256x128xf32>
    %24 = arith.addf %18, %23 : vector<256x128xf32>
    %25 = vector.extract_strided_slice %1 {offsets = [1, 1, 0], sizes = [16, 16, 4], strides = [1, 1, 1]} : vector<18x18x4xbf16> to vector<16x16x4xbf16>
    %26 = vector.shape_cast %25 : vector<16x16x4xbf16> to vector<256x4xbf16>
    %c4 = arith.constant 4 : index
    %c0_15 = arith.constant 0 : index
    %c0_16 = arith.constant 0 : index
    %27 = vector.load %arg3[%c4, %c0_15, %c0_16] : memref<9x4x128xbf16, #tpu.memory_space<vmem>>, vector<1x4x128xbf16>
    %28 = vector.shape_cast %27 : vector<1x4x128xbf16> to vector<4x128xbf16>
    %cst_17 = arith.constant dense<0.000000e+00> : vector<256x128xf32>
    %29 = tpu.matmul %26, %28, %cst_17 {dimension_numbers = #tpu.dot_dimension_numbers<[1], [0], [0], [1], [0, 0, 1, 1], [], []>} : vector<256x4xbf16>, vector<4x128xbf16>, vector<256x128xf32> -> vector<256x128xf32>
    %30 = arith.addf %24, %29 : vector<256x128xf32>
    %31 = vector.extract_strided_slice %1 {offsets = [1, 2, 0], sizes = [16, 16, 4], strides = [1, 1, 1]} : vector<18x18x4xbf16> to vector<16x16x4xbf16>
    %32 = vector.shape_cast %31 : vector<16x16x4xbf16> to vector<256x4xbf16>
    %c5 = arith.constant 5 : index
    %c0_18 = arith.constant 0 : index
    %c0_19 = arith.constant 0 : index
    %33 = vector.load %arg3[%c5, %c0_18, %c0_19] : memref<9x4x128xbf16, #tpu.memory_space<vmem>>, vector<1x4x128xbf16>
    %34 = vector.shape_cast %33 : vector<1x4x128xbf16> to vector<4x128xbf16>
    %cst_20 = arith.constant dense<0.000000e+00> : vector<256x128xf32>
    %35 = tpu.matmul %32, %34, %cst_20 {dimension_numbers = #tpu.dot_dimension_numbers<[1], [0], [0], [1], [0, 0, 1, 1], [], []>} : vector<256x4xbf16>, vector<4x128xbf16>, vector<256x128xf32> -> vector<256x128xf32>
    %36 = arith.addf %30, %35 : vector<256x128xf32>
    %37 = vector.extract_strided_slice %1 {offsets = [2, 0, 0], sizes = [16, 16, 4], strides = [1, 1, 1]} : vector<18x18x4xbf16> to vector<16x16x4xbf16>
    %38 = vector.shape_cast %37 : vector<16x16x4xbf16> to vector<256x4xbf16>
    %c6 = arith.constant 6 : index
    %c0_21 = arith.constant 0 : index
    %c0_22 = arith.constant 0 : index
    %39 = vector.load %arg3[%c6, %c0_21, %c0_22] : memref<9x4x128xbf16, #tpu.memory_space<vmem>>, vector<1x4x128xbf16>
    %40 = vector.shape_cast %39 : vector<1x4x128xbf16> to vector<4x128xbf16>
    %cst_23 = arith.constant dense<0.000000e+00> : vector<256x128xf32>
    %41 = tpu.matmul %38, %40, %cst_23 {dimension_numbers = #tpu.dot_dimension_numbers<[1], [0], [0], [1], [0, 0, 1, 1], [], []>} : vector<256x4xbf16>, vector<4x128xbf16>, vector<256x128xf32> -> vector<256x128xf32>
    %42 = arith.addf %36, %41 : vector<256x128xf32>
    %43 = vector.extract_strided_slice %1 {offsets = [2, 1, 0], sizes = [16, 16, 4], strides = [1, 1, 1]} : vector<18x18x4xbf16> to vector<16x16x4xbf16>
    %44 = vector.shape_cast %43 : vector<16x16x4xbf16> to vector<256x4xbf16>
    %c7 = arith.constant 7 : index
    %c0_24 = arith.constant 0 : index
    %c0_25 = arith.constant 0 : index
    %45 = vector.load %arg3[%c7, %c0_24, %c0_25] : memref<9x4x128xbf16, #tpu.memory_space<vmem>>, vector<1x4x128xbf16>
    %46 = vector.shape_cast %45 : vector<1x4x128xbf16> to vector<4x128xbf16>
    %cst_26 = arith.constant dense<0.000000e+00> : vector<256x128xf32>
    %47 = tpu.matmul %44, %46, %cst_26 {dimension_numbers = #tpu.dot_dimension_numbers<[1], [0], [0], [1], [0, 0, 1, 1], [], []>} : vector<256x4xbf16>, vector<4x128xbf16>, vector<256x128xf32> -> vector<256x128xf32>
    %48 = arith.addf %42, %47 : vector<256x128xf32>
    %49 = vector.extract_strided_slice %1 {offsets = [2, 2, 0], sizes = [16, 16, 4], strides = [1, 1, 1]} : vector<18x18x4xbf16> to vector<16x16x4xbf16>
    %50 = vector.shape_cast %49 : vector<16x16x4xbf16> to vector<256x4xbf16>
    %c8 = arith.constant 8 : index
    %c0_27 = arith.constant 0 : index
    %c0_28 = arith.constant 0 : index
    %51 = vector.load %arg3[%c8, %c0_27, %c0_28] : memref<9x4x128xbf16, #tpu.memory_space<vmem>>, vector<1x4x128xbf16>
    %52 = vector.shape_cast %51 : vector<1x4x128xbf16> to vector<4x128xbf16>
    %cst_29 = arith.constant dense<0.000000e+00> : vector<256x128xf32>
    %53 = tpu.matmul %50, %52, %cst_29 {dimension_numbers = #tpu.dot_dimension_numbers<[1], [0], [0], [1], [0, 0, 1, 1], [], []>} : vector<256x4xbf16>, vector<4x128xbf16>, vector<256x128xf32> -> vector<256x128xf32>
    %54 = arith.addf %48, %53 : vector<256x128xf32>
    %c0_30 = arith.constant 0 : index
    %c0_31 = arith.constant 0 : index
    %55 = vector.load %arg4[%c0_30, %c0_31] : memref<1x128xf32, #tpu.memory_space<vmem>>, vector<1x128xf32>
    %56 = vector.broadcast %55 : vector<1x128xf32> to vector<256x128xf32>
    %57 = arith.mulf %54, %56 : vector<256x128xf32>
    %c0_32 = arith.constant 0 : index
    %c0_33 = arith.constant 0 : index
    %58 = vector.load %arg5[%c0_32, %c0_33] : memref<1x128xf32, #tpu.memory_space<vmem>>, vector<1x128xf32>
    %59 = vector.broadcast %58 : vector<1x128xf32> to vector<256x128xf32>
    %60 = arith.addf %57, %59 : vector<256x128xf32>
    %c0_34 = arith.constant 0 : index
    %c0_35 = arith.constant 0 : index
    %c0_36 = arith.constant 0 : index
    %c0_37 = arith.constant 0 : index
    %61 = vector.load %arg6[%c0_34, %c0_35, %c0_36, %c0_37] : memref<1x16x16x128xbf16, #tpu.memory_space<vmem>>, vector<1x16x16x128xbf16>
    %62 = vector.shape_cast %61 : vector<1x16x16x128xbf16> to vector<16x16x128xbf16>
    %63 = vector.shape_cast %62 : vector<16x16x128xbf16> to vector<256x128xbf16>
    %64 = arith.extf %63 : vector<256x128xbf16> to vector<256x128xf32>
    %65 = arith.addf %60, %64 : vector<256x128xf32>
    %cst_38 = arith.constant 0.000000e+00 : f32
    %66 = vector.broadcast %cst_38 : f32 to vector<256x128xf32>
    %67 = arith.maximumf %65, %66 : vector<256x128xf32>
    %68 = vector.shape_cast %67 : vector<256x128xf32> to vector<1x16x16x128xf32>
    %c0_39 = arith.constant 0 : index
    %c0_40 = arith.constant 0 : index
    %c0_41 = arith.constant 0 : index
    %c0_42 = arith.constant 0 : index
    %69 = vector.load %arg7[%c0_39, %c0_40, %c0_41, %c0_42] : memref<1x16x16x128xf32, #tpu.memory_space<vmem>>, vector<1x16x16x128xf32>
    tpu.vector_store %arg7[%c0_39, %c0_40, %c0_41, %c0_42], %68 {strides = array<i32>} : memref<1x16x16x128xf32, #tpu.memory_space<vmem>>, vector<1x16x16x128xf32>,
    return
  }
  func.func @transform_0(%arg0: i32, %arg1: i32) -> (i32, i32, i32, i32) {
    %c0_i32 = arith.constant 0 : i32
    %c0_i32_0 = arith.constant 0 : i32
    %c0_i32_1 = arith.constant 0 : i32
    %c0_i32_2 = arith.constant 0 : i32
    return %arg0, %c0_i32, %c0_i32_0, %c0_i32_1 : i32, i32, i32, i32
  }
  func.func @transform_1(%arg0: i32, %arg1: i32) -> (i32, i32, i32) {
    %c0_i32 = arith.constant 0 : i32
    %c0_i32_0 = arith.constant 0 : i32
    %c0_i32_1 = arith.constant 0 : i32
    return %c0_i32, %c0_i32_0, %arg1 : i32, i32, i32
  }
  func.func @transform_2(%arg0: i32, %arg1: i32) -> (i32, i32) {
    %c0_i32 = arith.constant 0 : i32
    %c0_i32_0 = arith.constant 0 : i32
    return %c0_i32, %arg1 : i32, i32
  }
  func.func @transform_3(%arg0: i32, %arg1: i32) -> (i32, i32) {
    %c0_i32 = arith.constant 0 : i32
    %c0_i32_0 = arith.constant 0 : i32
    return %c0_i32, %arg1 : i32, i32
  }
  func.func @transform_4(%arg0: i32, %arg1: i32) -> (i32, i32, i32, i32) {
    %c0_i32 = arith.constant 0 : i32
    %c0_i32_0 = arith.constant 0 : i32
    %c0_i32_1 = arith.constant 0 : i32
    return %arg0, %c0_i32, %c0_i32_0, %arg1 : i32, i32, i32, i32
  }
  func.func @transform_5(%arg0: i32, %arg1: i32) -> (i32, i32, i32, i32) {
    %c0_i32 = arith.constant 0 : i32
    %c0_i32_0 = arith.constant 0 : i32
    %c0_i32_1 = arith.constant 0 : i32
    return %arg0, %c0_i32, %c0_i32_0, %arg1 : i32, i32, i32, i32
  }
}

</mosaic_0001>

<bundles_post_ra>
// kernel: tpu_custom_call.1
= control target key start
LH: loop header
LB: loop body
LE: loop exit
PB: predicated region body
PF: predicated region fallthrough
CT: control target
= control target key end

     0   :  { %10 = vsyncpa [#allocation3], 0  ;;  %s4584_s0 = inlined_call_operand.vmem [shape: bf16[2,18,18,4], index: 0, kind: input, shape index: {}]   ;;  %s4585_s1 = inlined_call_operand.vmem [shape: bf16[9,4,128], index: 1, kind: input, shape index: {}]   ;;  %s4586_s2 = inlined_call_operand.vmem [shape: f32[1,128], index: 2, kind: input, shape index: {}]   ;;  %s4587_s3 = inlined_call_operand.vmem [shape: f32[1,128], index: 3, kind: input, shape index: {}]   ;;  %s4588_s4 = inlined_call_operand.vmem [shape: bf16[2,16,16,128], index: 4, kind: input, shape index: {}]   ;;  %s4589_s5 = inlined_call_operand.hbm [shape: f32[2,16,16,128], index: 5, kind: output, shape index: {}]  }
   0x1   :  { %12 = vsyncpa [#allocation3 + $0x1], 0  ;;  %s3302_s18 = smov 0   ;;  %s3304_s19 = smov 0  }
   0x2   :  { %s3306_s20 = smov 0   ;;  %s3308_s21 = smov 0  }
   0x3   :  { %s3310_s22 = smov 0   ;;  %s3312_s23 = smov 0  }
   0x4 LB: > { %s2759_s24 = sadd.s32 4294967295, %s3268_s23   ;;  %s2760_s25 = sadd.s32 4294967294, %s3268_s23   ;;  %s3268_s23 = sphi %s3312_s23, %s18_s23   ;;  %s3264_s22 = sphi %s3310_s22, %s4734_s22   ;;  %s3260_s21 = sphi %s3308_s21, %s4733_s21   ;;  %s3256_s20 = sphi %s3306_s20, %s4732_s20   ;;  %s3252_s19 = sphi %s3304_s19, %s4731_s19   ;;  %s3248_s18 = sphi %s3302_s18, %s4730_s18  }
   0x5   : > { %s30_s26 = sadd.s32 1, %s3264_s22  ;;  %s171_s27 = sadd.s32 1, %s3256_s20 }
   0x6   : > { %p32_p0 = scmp.ge.s32.totalorder %s30_s26, 2  ;;  %p181_p1 = scmp.ne.s32.totalorder %s3256_s20, %s3252_s19 }
   0x7   : > { %p182_p2 = scmp.eq.s32.totalorder %s2759_s24, 1  ;;  %p187_p3 = scmp.ne.s32.totalorder %s3252_s19, %s3248_s18 }
   0x8   : > { %s4736_s26 = smov (%p32_p0, %s30_s26), 0  ;;  %p188_p5 = scmp.eq.s32.totalorder %s2760_s25, 1 }
   0x9   : > { %p3342_p4 = por %p182_p2, %p181_p1  ;;  %s166_s29 = ssub.s32 %s3264_s22, %s4736_s26 }
   0xa   : > { %p2766_p6 = scmp.ge.s32.totalorder %s3268_s23, 1  ;;  %p169_p7 = scmp.eq.s32.totalorder %s166_s29, 0 }
   0xb   : > { %p3349_p8 = por %p188_p5, %p187_p3  ;;  %p244_p9 = scmp.lt.s32.totalorder %s3268_s23, 3 }
   0xc   : > { %s3355_s6 = scalar_select %p169_p7, %s3256_s20, %s171_s27  }
   0xd   : > { %p245_p10 = pnand %p2766_p6, %p244_p9 }
   0xf   : > { %248 = sbr.rel (%p245_p10) target bundleno = 775 (0x307), region = 40 }
  0x14   : > { %v2771_v0 = vld [vmem:[%s4585_s1 + $0x2] sm:$0x3]  ;;  %vm855_vm0 = vcmask 1041408   ;;  %p290_p11 = scmp.lt.s32.totalorder %s3260_s21, 1  ;;  %v2884_v2 = vld [vmem:[%s4585_s1 + $0x4] sm:$0x3] }
  0x15   : > { %v857_v1 = vsel %vm855_vm0, %v2771_v0, 0  ;;  %v1398_v3 = vsel %vm855_vm0, %v2884_v2, 0  ;;  %v2901_v4 = vld [vmem:[%s4585_s1 + $0x6] sm:$0x3]  ;;  %v368_v5 = vld [vmem:[%s4585_s1] sm:$0x3] }
  0x16   : > { %3117 = vmatpush.bf16.msra.mxu1 %v857_v1  ;;  %3118 = vmatpush.bf16.msra.mxu2 %v857_v1  ;;  %s3366_s11 = scalar_select %p290_p11, %s3260_s21, 1  ;;  %v2922_v6 = vld [vmem:[%s4585_s1 + $0x8] sm:$0x3]  ;;  %v1532_v7 = vsel %vm855_vm0, %v2901_v4, 0  ;;  %v1077_v8 = vsel %vm855_vm0, %v368_v5, 0  ;;  %vm806_vm4 = vcmask 31744  }
  0x17   : > { %3119 = vmatpush.bf16.msra.mxu3 %v857_v1  ;;  %866 = vmatpush.bf16.msra.mxu0 %v857_v1  ;;  %v1688_v9 = vsel %vm855_vm0, %v2922_v6, 0  ;;  %vm369_vm1 = vsmask.f32 3328  ;;  %vm370_vm2 = vsmask.f32 7440  ;;  %vm1184_vm5 = vcmask 1042432  }
  0x18   : > { %s3120_s24 = smul.u32 216, %s3366_s11  ;;  %vm3412_vm3 = vmor %vm369_vm1, %vm370_vm2  ;;  %vm1185_vm6 = vcmask 1046532   ;;  %s3018_s16 = sshll.u32 %s3366_s11, 7 }
  0x19   : > { %vm3715_vm7 = vmor %vm1184_vm5, %vm1185_vm6  ;;  %s4301_s25 = scalar_lea.vmem %s4588_s4, %s3018_s16  ;;  %s287_s9 = sand.u32 1, %s3252_s19  }
  0x1a   : > { %1407 = vmatpush.bf16.msrb.mxu2 %v1398_v3  ;;  %1086 = vmatpush.bf16.msrb.mxu1 %v1077_v8  ;;  %s3385_s29 = scalar_lea.vmem %s4584_s0, %s3120_s24  ;;  %s2767_s10 = sshll.u32 %s287_s9, 8 }
  0x1b   : > { %1541 = vmatpush.bf16.msrb.mxu3 %v1532_v7  ;;  %1697 = vmatpush.bf16.msrb.mxu0 %v1688_v9  ;;  %v3388_v10 = vld [vmem:[%s3385_s29 + $0x30] sm:$0xf]  ;;  %v3391_v11 = vld [vmem:[%s3385_s29 + $0x34] sm:$0xf]  ;;  %v3394_v12 = vld [vmem:[%s3385_s29 + $0x38] sm:$0x1] }
  0x1c   : > { %v469_v13 = vshrl.u32 %v3388_v10, 16  ;;  %v472_v14 = vshll.u32 %v3388_v10, 16  ;;  %v478_v15 = vshll.u32 %v3391_v11, 16  ;;  %v482_v16 = vshrl.u32 %v3391_v11, 16  ;;  %v338_v17 = vld [vmem:[%s3385_s29 + $0x60] sm:$0xf] }
  0x1d   : > { %v488_v18 = vshll.u32 %v3394_v12, 16  ;;  %v3403_v19 = vld [vmem:[%s3385_s29 + $0x64] sm:$0xf]  ;;  %v340_v20 = vld [vmem:[%s3385_s29 + $0x68] sm:$0x1]  ;;  %v565_v21 = vshrl.u32 %v338_v17, 16 }
  0x1e   : > { %v471_v22 = vrot.slane %v469_v13, 4  ;;  %v474_v23 = vrot.slane %v472_v14, 5  ;;  %v480_v24 = vrot.slane %v478_v15, 5  ;;  %v484_v25 = vrot.slane %v482_v16, 4  ;;  %v350_v26 = vld [vmem:[%s3385_s29 + $0x90] sm:$0xf] }
  0x1f   : > { %v490_v27 = vrot.slane %v488_v18, 5  ;;  %v567_v28 = vrot.slane %v565_v21, 4  ;;  %v568_v29 = vshll.u32 %v338_v17, 16  ;;  %v574_v30 = vshll.u32 %v3403_v19, 16  ;;  %v351_v35 = vld [vmem:[%s3385_s29 + $0x94] sm:$0xf] }
  0x20   : > { %v475_v31 = vor.u32 %v474_v23, %v471_v22  ;;  %v485_v32 = vor.u32 %v484_v25, %v480_v24  ;;  %v578_v33 = vshrl.u32 %v3403_v19, 16  ;;  %v584_v34 = vshll.u32 %v340_v20, 16  ;;  %v352_v45 = vld [vmem:[%s3385_s29 + $0x98] sm:$0x1]  ;;  %v3422_v61 = vld [vmem:[%s3385_s29] sm:$0xf] }
  0x21   : > { %v570_v37 = vrot.slane %v568_v29, 5  ;;  %v576_v38 = vrot.slane %v574_v30, 5  ;;  %v661_v39 = vshrl.u32 %v350_v26, 16  ;;  %v664_v47 = vshll.u32 %v350_v26, 16  ;;  %v3429_v1 = vld [vmem:[%s3385_s29 + $0x4] sm:$0xf] }
  0x22   : > { %v476_v40 = vrot.slane %v475_v31, 4  ;;  %v486_v41 = vrot.slane %v485_v32, 4  ;;  %v580_v42 = vrot.slane %v578_v33, 4  ;;  %v586_v43 = vrot.slane %v584_v34, 5  ;;  %v3432_v2 = vld [vmem:[%s3385_s29 + $0x8] sm:$0x1] }
  0x23   : > { %v571_v44 = vor.u32 %v570_v37, %v567_v28  ;;  %v663_v46 = vrot.slane %v661_v39, 4  ;;  %v670_v48 = vshll.u32 %v351_v35, 16  ;;  %v674_v52 = vshrl.u32 %v351_v35, 16  ;;  %v3448_v23 = vld [vmem:[%s3385_s29 + $0x3c] sm:$0xf]  ;;  %s4327_s12 = scalar_lea.vmem [#allocation2], %s2767_s10 }
  0x24   : > { %v481_v49 = vsel %vm3412_vm3, %v476_v40, %v480_v24  ;;  %v491_v50 = vsel %vm3412_vm3, %v486_v41, %v490_v27  ;;  %v581_v51 = vor.u32 %v580_v42, %v576_v38  ;;  %v666_v56 = vrot.slane %v664_v47, 5  ;;  %v3451_v24 = vld [vmem:[%s3385_s29 + $0x40] sm:$0xf]  ;;  %v3456_v29 = vld [vmem:[%s3385_s29 + $0x44] sm:$0x1]  ;;  %s3037_s16 = sshll.u32 %s3260_s21, 8 }
  0x25   : > { %v766_v53 = vunpack.c.l.b16 %v481_v49  ;;  %v767_v54 = vunpack.c.l.b16 %v491_v50  ;;  %v572_v55 = vrot.slane %v571_v44, 4  ;;  %v672_v58 = vrot.slane %v670_v48, 5  ;;  %v3471_v47 = vld [vmem:[%s3385_s29 + $0x70] sm:$0xf]  ;;  %s2627_s27 = sshll.u32 %s4327_s12, 4  ;;  %s2614_s21 = scalar_lea.sflag [#allocation3], %s287_s9  ;;  %s2628_s27 = int_to_ptr.vmem [resolvable:$true] %s2627_s27 }
  0x26   : > { %v582_v57 = vrot.slane %v581_v51, 4  ;;  %v676_v59 = vrot.slane %v674_v52, 4  ;;  %v680_v60 = vshll.u32 %v352_v45, 16  ;;  %v667_v0 = vor.u32 %v666_v56, %v663_v46  ;;  %v3478_v51 = vld [vmem:[%s3385_s29 + $0x74] sm:$0x1]  ;;  %s3210_s13 = scalar_lea.hbm %s4589_s5, 512 }
  0x27   : > { %v3424_v62 = vpack.c.b16 %v767_v54, %v766_v53  ;;  %v577_v63 = vsel %vm3412_vm3, %v572_v55, %v576_v38  ;;  %v373_v9 = vshrl.u32 %v3422_v61, 16  ;;  %v376_v13 = vshll.u32 %v3422_v61, 16  ;;  %v3464_v38 = vld [vmem:[%s3385_s29 + $0x6c] sm:$0xf] }
  0x28   : > { %v587_v3 = vsel %vm3412_vm3, %v582_v57, %v586_v43  ;;  %v774_v4 = vunpack.c.l.b16 %v577_v63  ;;  %v677_v5 = vor.u32 %v676_v59, %v672_v58  ;;  %v682_v6 = vrot.slane %v680_v60, 5 }
  0x29   : > { %2776 = vmatmul.msk.bf16.vlgmr.msra.gmra.mxu1 %vm806_vm4, %v3424_v62  ;;  %v775_v7 = vunpack.c.l.b16 %v587_v3  ;;  %v668_v8 = vrot.slane %v667_v0, 4  ;;  %v382_v15 = vshll.u32 %v3429_v1, 16  ;;  %v386_v16 = vshrl.u32 %v3429_v1, 16 }
  0x2a   : > { %v678_v14 = vrot.slane %v677_v5, 4  ;;  %v392_v17 = vshll.u32 %v3432_v2, 16  ;;  %v375_v21 = vrot.slane %v373_v9, 4  ;;  %v378_v22 = vrot.slane %v376_v13, 5  ;;  %v353_v5 = vld [vmem:[%s3385_s29 + $0x9c] sm:$0xf] }
  0x2b   : > { %v3443_v18 = vpack.c.b16 %v775_v7, %v774_v4  ;;  %v673_v20 = vsel %vm3412_vm3, %v668_v8, %v672_v58  ;;  %v384_v27 = vrot.slane %v382_v15, 5  ;;  %v388_v28 = vrot.slane %v386_v16, 4  ;;  %v354_v9 = vld [vmem:[%s3385_s29 + $0xa0] sm:$0xf] }
  0x2c   : > { %v683_v25 = vsel %vm3412_vm3, %v678_v14, %v682_v6  ;;  %v782_v26 = vunpack.c.l.b16 %v673_v20  ;;  %v379_v31 = vor.u32 %v378_v22, %v375_v21  ;;  %v394_v32 = vrot.slane %v392_v17, 5  ;;  %v355_v17 = vld [vmem:[%s3385_s29 + $0xa4] sm:$0x1] }
  0x2d   : > { %4634 = vst [vmem:[#allocation5_spill] sm:$0xff] %v3443_v18  ;;  %2780 = vmatmul.msk.bf16.vlgmr.msra.gmra.mxu2 %vm806_vm4, %v3443_v18  ;;  %v783_v30 = vunpack.c.l.b16 %v683_v25  ;;  %v389_v33 = vor.u32 %v388_v28, %v384_v27  ;;  %v493_v34 = vshrl.u32 %v3448_v23, 16  ;;  %v496_v35 = vshll.u32 %v3448_v23, 16 }
  0x2e   : > { %v502_v37 = vshll.u32 %v3451_v24, 16  ;;  %v380_v40 = vrot.slane %v379_v31, 4  ;;  %v506_v41 = vshrl.u32 %v3451_v24, 16  ;;  %v512_v42 = vshll.u32 %v3456_v29, 16 }
  0x2f   : > { %v3466_v39 = vpack.c.b16 %v783_v30, %v782_v26  ;;  %v390_v43 = vrot.slane %v389_v33, 4  ;;  %v495_v44 = vrot.slane %v493_v34, 4  ;;  %v498_v45 = vrot.slane %v496_v35, 5  ;;  %v3496_v35 = vld [vmem:[%s3385_s29 + $0xc] sm:$0xf] }
  0x30   : > { %v504_v46 = vrot.slane %v502_v37, 5  ;;  %v385_v48 = vsel %vm3412_vm3, %v380_v40, %v384_v27  ;;  %v508_v49 = vrot.slane %v506_v41, 4  ;;  %v514_v50 = vrot.slane %v512_v42, 5 }
  0x31   : > { %4635 = vst [vmem:[#allocation6_spill] sm:$0xff] %v3466_v39  ;;  %2784 = vmatmul.msk.bf16.vlgmr.msra.gmra.mxu3 %vm806_vm4, %v3466_v39  ;;  %v589_v52 = vshrl.u32 %v3464_v38, 16  ;;  %v395_v53 = vsel %vm3412_vm3, %v390_v43, %v394_v32  ;;  %v758_v54 = vunpack.c.l.b16 %v385_v48  ;;  %v499_v55 = vor.u32 %v498_v45, %v495_v44  ;;  %v3503_v43 = vld [vmem:[%s3385_s29 + $0x10] sm:$0xf]  ;;  %v3506_v48 = vld [vmem:[%s3385_s29 + $0x14] sm:$0x1] }
  0x32   : > { %v592_v56 = vshll.u32 %v3464_v38, 16  ;;  %v759_v57 = vunpack.c.l.b16 %v395_v53  ;;  %v509_v58 = vor.u32 %v508_v49, %v504_v46  ;;  %v598_v60 = vshll.u32 %v3471_v47, 16  ;;  %v3683_v39 = vld [vmem:[%s3385_s29 + $0x2c] sm:$0x1] }
  0x33   : > { %v591_v59 = vrot.slane %v589_v52, 4  ;;  %v500_v63 = vrot.slane %v499_v55, 4  ;;  %v602_v3 = vshrl.u32 %v3471_v47, 16  ;;  %v608_v4 = vshll.u32 %v3478_v51, 16 }
  0x34   : > { %v594_v0 = vrot.slane %v592_v56, 5  ;;  %v790_v6 = vpack.c.b16 %v759_v57, %v758_v54  ;;  %v510_v7 = vrot.slane %v509_v58, 4  ;;  %v600_v8 = vrot.slane %v598_v60, 5  ;;  %v3516_v58 = vld [vmem:[%s3385_s29 + $0x48] sm:$0xf] }
  0x35   : > { %v505_v13 = vsel %vm3412_vm3, %v500_v63, %v504_v46  ;;  %v604_v15 = vrot.slane %v602_v3, 4  ;;  %v610_v16 = vrot.slane %v608_v4, 5  ;;  %v685_v22 = vshrl.u32 %v353_v5, 16  ;;  %v3521_v3 = vld [vmem:[%s3385_s29 + $0x4c] sm:$0xf] }
  0x36   : > { %v595_v14 = vor.u32 %v594_v0, %v591_v59  ;;  %2772 = vmatmul.msk.bf16.vlgmr.msra.gmra.mxu0 %vm806_vm4, %v790_v6  ;;  %v515_v20 = vsel %vm3412_vm3, %v510_v7, %v514_v50  ;;  %v768_v21 = vunpack.c.l.b16 %v505_v13  ;;  %v688_v25 = vshll.u32 %v353_v5, 16 }
  0x37   : > { %v769_v26 = vunpack.c.l.b16 %v515_v20  ;;  %v605_v28 = vor.u32 %v604_v15, %v600_v8  ;;  %v694_v30 = vshll.u32 %v354_v9, 16  ;;  %v687_v31 = vrot.slane %v685_v22, 4  ;;  %v3528_v15 = vld [vmem:[%s3385_s29 + $0x50] sm:$0x1] }
  0x38   : > { %v596_v27 = vrot.slane %v595_v14, 4  ;;  %v690_v32 = vrot.slane %v688_v25, 5  ;;  %v698_v33 = vshrl.u32 %v354_v9, 16  ;;  %v704_v34 = vshll.u32 %v355_v17, 16 }
  0x39   : > { %v3498_v37 = vpack.c.b16 %v769_v26, %v768_v21  ;;  %v606_v41 = vrot.slane %v605_v28, 4  ;;  %v696_v42 = vrot.slane %v694_v30, 5  ;;  %v397_v52 = vshrl.u32 %v3496_v35, 16  ;;  %v3539_v28 = vld [vmem:[%s3385_s29 + $0x78] sm:$0xf] }
  0x3a   : > { %v601_v40 = vsel %vm3412_vm3, %v596_v27, %v600_v8  ;;  %v691_v45 = vor.u32 %v690_v32, %v687_v31  ;;  %v700_v46 = vrot.slane %v698_v33, 4  ;;  %v706_v50 = vrot.slane %v704_v34, 5  ;;  %v3543_v34 = vld [vmem:[%s3385_s29 + $0x7c] sm:$0xf] }
  0x3b   : > { %v776_v44 = vunpack.c.l.b16 %v601_v40  ;;  %2777 = vmatmul.msk.bf16.gmra.mxu1 %vm806_vm4, %v3498_v37  ;;  %v611_v49 = vsel %vm3412_vm3, %v606_v41, %v610_v16  ;;  %v400_v53 = vshll.u32 %v3496_v35, 16  ;;  %v406_v57 = vshll.u32 %v3503_v43, 16 }
  0x3c   : > { %v777_v54 = vunpack.c.l.b16 %v611_v49  ;;  %v692_v55 = vrot.slane %v691_v45, 4  ;;  %v701_v56 = vor.u32 %v700_v46, %v696_v42  ;;  %v399_v59 = vrot.slane %v397_v52, 4 }
  0x3d   : > { %v402_v60 = vrot.slane %v400_v53, 5  ;;  %v410_v63 = vshrl.u32 %v3503_v43, 16  ;;  %v416_v0 = vshll.u32 %v3506_v48, 16  ;;  %v408_v7 = vrot.slane %v406_v57, 5 }
  0x3e   : > { %v3523_v4 = vpack.c.b16 %v777_v54, %v776_v44  ;;  %v697_v5 = vsel %vm3412_vm3, %v692_v55, %v696_v42  ;;  %v702_v6 = vrot.slane %v701_v56, 4  ;;  %v517_v17 = vshrl.u32 %v3516_v58, 16 }
  0x3f   : > { %v784_v8 = vunpack.c.l.b16 %v697_v5  ;;  %v403_v9 = vor.u32 %v402_v60, %v399_v59  ;;  %v412_v13 = vrot.slane %v410_v63, 4  ;;  %v418_v14 = vrot.slane %v416_v0, 5 }
  0x40   : > { %2781 = vmatmul.msk.bf16.gmra.mxu2 %vm806_vm4, %v3523_v4  ;;  %v707_v16 = vsel %vm3412_vm3, %v702_v6, %v706_v50  ;;  %v520_v20 = vshll.u32 %v3516_v58, 16  ;;  %v526_v21 = vshll.u32 %v3521_v3, 16  ;;  %v530_v27 = vshrl.u32 %v3521_v3, 16  ;;  %v3550_v50 = vld [vmem:[%s3385_s29 + $0x80] sm:$0x1] }
  0x41   : > { %v785_v22 = vunpack.c.l.b16 %v707_v16  ;;  %v404_v25 = vrot.slane %v403_v9, 4  ;;  %v413_v26 = vor.u32 %v412_v13, %v408_v7  ;;  %v519_v30 = vrot.slane %v517_v17, 4  ;;  %v3569_v16 = vld [vmem:[%s3385_s29 + $0xac] sm:$0xf]  ;;  %v3572_v17 = vld [vmem:[%s3385_s29 + $0xb0] sm:$0x1] }
  0x42   : > { %v522_v31 = vrot.slane %v520_v20, 5  ;;  %v528_v32 = vrot.slane %v526_v21, 5  ;;  %v536_v33 = vshll.u32 %v3528_v15, 16  ;;  %v532_v44 = vrot.slane %v530_v27, 4  ;;  %4638 = vst [vmem:[#allocation9_spill] sm:$0xff] %v3569_v16 }
  0x43   : > { %v3545_v40 = vpack.c.b16 %v785_v22, %v784_v8  ;;  %v409_v41 = vsel %vm3412_vm3, %v404_v25, %v408_v7  ;;  %v414_v42 = vrot.slane %v413_v26, 4  ;;  %v613_v52 = vshrl.u32 %v3539_v28, 16  ;;  %v3562_v8 = vld [vmem:[%s3385_s29 + $0xa8] sm:$0xf]  ;;  %4639 = vst [vmem:[#allocation10_spill] sm:$0xff] %v3572_v17 }
  0x44   : > { %v760_v45 = vunpack.c.l.b16 %v409_v41  ;;  %v523_v46 = vor.u32 %v522_v31, %v519_v30  ;;  %v538_v49 = vrot.slane %v536_v33, 5  ;;  %v533_v54 = vor.u32 %v532_v44, %v528_v32  ;;  %4637 = vst [vmem:[#allocation8_spill] sm:$0xff] %v3562_v8 }
  0x45   : > { %4636 = vst [vmem:[#allocation7_spill] sm:$0xff] %v3545_v40  ;;  %2785 = vmatmul.msk.bf16.gmra.mxu3 %vm806_vm4, %v3545_v40  ;;  %v419_v53 = vsel %vm3412_vm3, %v414_v42, %v418_v14  ;;  %v616_v55 = vshll.u32 %v3539_v28, 16  ;;  %v622_v56 = vshll.u32 %v3543_v34, 16  ;;  %v615_v60 = vrot.slane %v613_v52, 4  ;;  %v3586_v52 = vld [vmem:[%s3385_s29 + $0x18] sm:$0xf] }
  0x46   : > { %v761_v57 = vunpack.c.l.b16 %v419_v53  ;;  %v524_v59 = vrot.slane %v523_v46, 4  ;;  %v626_v63 = vshrl.u32 %v3543_v34, 16  ;;  %v534_v0 = vrot.slane %v533_v54, 4  ;;  %v3672_v40 = vld [vmem:[%s3385_s29 + $0x24] sm:$0xf] }
  0x47   : > { %v618_v5 = vrot.slane %v616_v55, 5  ;;  %v624_v6 = vrot.slane %v622_v56, 5  ;;  %v632_v7 = vshll.u32 %v3550_v50, 16  ;;  %v709_v30 = vshrl.u32 %v3562_v8, 16  ;;  %v3591_v56 = vld [vmem:[%s3385_s29 + $0x1c] sm:$0xf] }
  0x48   : > { %v3564_v9 = vpack.c.b16 %v761_v57, %v760_v45  ;;  %v529_v13 = vsel %vm3412_vm3, %v524_v59, %v528_v32  ;;  %v628_v14 = vrot.slane %v626_v63, 4  ;;  %v539_v20 = vsel %vm3412_vm3, %v534_v0, %v538_v49  ;;  %v3594_v57 = vld [vmem:[%s3385_s29 + $0x20] sm:$0x1] }
  0x49   : > { %v770_v21 = vunpack.c.l.b16 %v529_v13  ;;  %v619_v22 = vor.u32 %v618_v5, %v615_v60  ;;  %v634_v25 = vrot.slane %v632_v7, 5  ;;  %v771_v26 = vunpack.c.l.b16 %v539_v20 }
  0x4a   : > { %2773 = vmatmul.msk.bf16.gmra.mxu0 %vm806_vm4, %v3564_v9  ;;  %v629_v27 = vor.u32 %v628_v14, %v624_v6  ;;  %v712_v31 = vshll.u32 %v3562_v8, 16  ;;  %v718_v33 = vshll.u32 %v3569_v16, 16  ;;  %v722_v41 = vshrl.u32 %v3569_v16, 16 }
  0x4b   : > { %v620_v32 = vrot.slane %v619_v22, 4  ;;  %v728_v42 = vshll.u32 %v3572_v17, 16  ;;  %v3583_v44 = vpack.c.b16 %v771_v26, %v770_v21  ;;  %v711_v46 = vrot.slane %v709_v30, 4  ;;  %v3606_v26 = vld [vmem:[%s3385_s29 + $0x54] sm:$0xf] }
  0x4c   : > { %v630_v45 = vrot.slane %v629_v27, 4  ;;  %v714_v49 = vrot.slane %v712_v31, 5  ;;  %v720_v54 = vrot.slane %v718_v33, 5  ;;  %v724_v55 = vrot.slane %v722_v41, 4  ;;  %v3650_v17 = vld [vmem:[%s3385_s29 + $0xb4] sm:$0xf] }
  0x4d   : > { %4640 = vst [vmem:[#allocation11_spill] sm:$0xff] %v3583_v44  ;;  %v625_v53 = vsel %vm3412_vm3, %v620_v32, %v624_v6  ;;  %2778 = vmatmul.msk.bf16.gmra.mxu1 %vm806_vm4, %v3583_v44  ;;  %v730_v0 = vrot.slane %v728_v42, 5  ;;  %v421_v6 = vshrl.u32 %v3586_v52, 16  ;;  %v424_v13 = vshll.u32 %v3586_v52, 16  ;;  %v3611_v32 = vld [vmem:[%s3385_s29 + $0x58] sm:$0xf] }
  0x4e   : > { %v635_v59 = vsel %vm3412_vm3, %v630_v45, %v634_v25  ;;  %v778_v60 = vunpack.c.l.b16 %v625_v53  ;;  %v715_v63 = vor.u32 %v714_v49, %v711_v46  ;;  %v725_v7 = vor.u32 %v724_v55, %v720_v54  ;;  %v3616_v46 = vld [vmem:[%s3385_s29 + $0x5c] sm:$0x1]  ;;  %4643 = vst [vmem:[#allocation14_spill] sm:$0xff] %v3650_v17 }
  0x4f   : > { %v779_v5 = vunpack.c.l.b16 %v635_v59  ;;  %v430_v20 = vshll.u32 %v3591_v56, 16  ;;  %v434_v21 = vshrl.u32 %v3591_v56, 16  ;;  %v440_v22 = vshll.u32 %v3594_v57, 16 }
  0x50   : > { %v716_v14 = vrot.slane %v715_v63, 4  ;;  %v726_v27 = vrot.slane %v725_v7, 4  ;;  %v423_v30 = vrot.slane %v421_v6, 4  ;;  %v426_v31 = vrot.slane %v424_v13, 5  ;;  %v3626_v7 = vld [vmem:[%s3385_s29 + $0x84] sm:$0xf] }
  0x51   : > { %v3608_v25 = vpack.c.b16 %v779_v5, %v778_v60  ;;  %v432_v41 = vrot.slane %v430_v20, 5  ;;  %v436_v42 = vrot.slane %v434_v21, 4  ;;  %v442_v45 = vrot.slane %v440_v22, 5  ;;  %4641 = vst [vmem:[#allocation12_spill] sm:$0xff] %v3626_v7 }
  0x52   : > { %v721_v33 = vsel %vm3412_vm3, %v716_v14, %v720_v54  ;;  %v731_v49 = vsel %vm3412_vm3, %v726_v27, %v730_v0  ;;  %v427_v55 = vor.u32 %v426_v31, %v423_v30  ;;  %v541_v59 = vshrl.u32 %v3606_v26, 16  ;;  %v3633_v30 = vld [vmem:[%s3385_s29 + $0x88] sm:$0xf] }
  0x53   : > { %2782 = vmatmul.msk.bf16.gmra.mxu2 %vm806_vm4, %v3608_v25  ;;  %v786_v53 = vunpack.c.l.b16 %v721_v33  ;;  %v787_v60 = vunpack.c.l.b16 %v731_v49  ;;  %v437_v63 = vor.u32 %v436_v42, %v432_v41  ;;  %v544_v54 = vshll.u32 %v3606_v26, 16  ;;  %v3638_v49 = vld [vmem:[%s3385_s29 + $0x8c] sm:$0x1] }
  0x54   : > { %v550_v5 = vshll.u32 %v3611_v32, 16  ;;  %v428_v6 = vrot.slane %v427_v55, 4  ;;  %v543_v13 = vrot.slane %v541_v59, 4  ;;  %v554_v14 = vshrl.u32 %v3611_v32, 16 }
  0x55   : > { %v560_v0 = vshll.u32 %v3616_v46, 16  ;;  %v3630_v20 = vpack.c.b16 %v787_v60, %v786_v53  ;;  %v438_v21 = vrot.slane %v437_v63, 4  ;;  %v546_v22 = vrot.slane %v544_v54, 5 }
  0x56   : > { %v552_v27 = vrot.slane %v550_v5, 5  ;;  %v433_v31 = vsel %vm3412_vm3, %v428_v6, %v432_v41  ;;  %v556_v33 = vrot.slane %v554_v14, 4  ;;  %v637_v55 = vshrl.u32 %v3626_v7, 16 }
  0x57   : > { %4642 = vst [vmem:[#allocation13_spill] sm:$0xff] %v3630_v20  ;;  %v562_v42 = vrot.slane %v560_v0, 5  ;;  %2786 = vmatmul.msk.bf16.gmra.mxu3 %vm806_vm4, %v3630_v20  ;;  %v443_v53 = vsel %vm3412_vm3, %v438_v21, %v442_v45  ;;  %v762_v59 = vunpack.c.l.b16 %v433_v31  ;;  %v547_v60 = vor.u32 %v546_v22, %v543_v13  ;;  %v3655_v22 = vld [vmem:[%s3385_s29 + $0xb8] sm:$0xf] }
  0x58   : > { %v640_v63 = vshll.u32 %v3626_v7, 16  ;;  %v763_v54 = vunpack.c.l.b16 %v443_v53  ;;  %v557_v41 = vor.u32 %v556_v33, %v552_v27  ;;  %v639_v5 = vrot.slane %v637_v55, 4  ;;  %4644 = vst [vmem:[#allocation15_spill] sm:$0xff] %v3655_v22 }
  0x59   : > { %v646_v6 = vshll.u32 %v3633_v30, 16  ;;  %v548_v14 = vrot.slane %v547_v60, 4  ;;  %v650_v8 = vshrl.u32 %v3633_v30, 16  ;;  %v656_v20 = vshll.u32 %v3638_v49, 16  ;;  %v3660_v60 = vld [vmem:[%s3385_s29 + $0xbc] sm:$0x1] }
  0x5a   : > { %v642_v0 = vrot.slane %v640_v63, 5  ;;  %v3652_v45 = vpack.c.b16 %v763_v54, %v762_v59  ;;  %v558_v21 = vrot.slane %v557_v41, 4  ;;  %4645 = vst [vmem:[#allocation16_spill] sm:$0xff] %v3660_v60  ;;  %v733_v54 = vshrl.u32 %v3650_v17, 16 }
  0x5b   : > { %v648_v13 = vrot.slane %v646_v6, 5  ;;  %v553_v31 = vsel %vm3412_vm3, %v548_v14, %v552_v27  ;;  %v652_v55 = vrot.slane %v650_v8, 4  ;;  %v658_v53 = vrot.slane %v656_v20, 5 }
  0x5c   : > { %v643_v33 = vor.u32 %v642_v0, %v639_v5  ;;  %2774 = vmatmul.msk.bf16.gmra.mxu0 %vm806_vm4, %v3652_v45  ;;  %v563_v59 = vsel %vm3412_vm3, %v558_v21, %v562_v42  ;;  %v772_v63 = vunpack.c.l.b16 %v553_v31  ;;  %v736_v41 = vshll.u32 %v3650_v17, 16 }
  0x5d   : > { %v773_v6 = vunpack.c.l.b16 %v563_v59  ;;  %v653_v5 = vor.u32 %v652_v55, %v648_v13  ;;  %v742_v8 = vshll.u32 %v3655_v22, 16  ;;  %v735_v20 = vrot.slane %v733_v54, 4 }
  0x5e   : > { %v644_v27 = vrot.slane %v643_v33, 4  ;;  %v738_v14 = vrot.slane %v736_v41, 5  ;;  %v746_v0 = vshrl.u32 %v3655_v22, 16  ;;  %v752_v16 = vshll.u32 %v3660_v60, 16  ;;  %v3679_v33 = vld [vmem:[%s3385_s29 + $0x28] sm:$0xf] }
  0x5f   : > { %v3674_v42 = vpack.c.b16 %v773_v6, %v772_v63  ;;  %v654_v31 = vrot.slane %v653_v5, 4  ;;  %v744_v59 = vrot.slane %v742_v8, 5  ;;  %v1192_v55 = vrot.slane %v3432_v2, 5 }
  0x60   : > { %v649_v21 = vsel %vm3412_vm3, %v644_v27, %v648_v13  ;;  %v739_v54 = vor.u32 %v738_v14, %v735_v20  ;;  %v748_v41 = vrot.slane %v746_v0, 4  ;;  %v754_v6 = vrot.slane %v752_v16, 5 }
  0x61   : > { %4646 = vst [vmem:[#allocation17_spill] sm:$0xff] %v3674_v42  ;;  %v780_v17 = vunpack.c.l.b16 %v649_v21  ;;  %2779 = vmatmul.msk.bf16.gmra.mxu1 %vm806_vm4, %v3674_v42  ;;  %v659_v63 = vsel %vm3412_vm3, %v654_v31, %v658_v53  ;;  %v445_v13 = vshrl.u32 %v3672_v40, 16  ;;  %v448_v27 = vshll.u32 %v3672_v40, 16 }
  0x62   : > { %v781_v5 = vunpack.c.l.b16 %v659_v63  ;;  %v740_v8 = vrot.slane %v739_v54, 4  ;;  %v749_v60 = vor.u32 %v748_v41, %v744_v59  ;;  %v454_v2 = vshll.u32 %v3679_v33, 16  ;;  %v2957_v54 = vld [vmem:[%s4585_s1 + $0xc] sm:$0x3]  ;;  %v2978_v41 = vld [vmem:[%s4585_s1 + $0xe] sm:$0x3] }
  0x63   : > { %v447_v20 = vrot.slane %v445_v13, 4  ;;  %v450_v14 = vrot.slane %v448_v27, 5  ;;  %v458_v0 = vshrl.u32 %v3679_v33, 16  ;;  %v464_v21 = vshll.u32 %v3683_v39, 16 }
  0x64   : > { %v3694_v22 = vpack.c.b16 %v781_v5, %v780_v17  ;;  %v745_v16 = vsel %vm3412_vm3, %v740_v8, %v744_v59  ;;  %v750_v53 = vrot.slane %v749_v60, 4  ;;  %v456_v31 = vrot.slane %v454_v2, 5  ;;  %v2940_v17 = vld [vmem:[%s4585_s1 + $0xa] sm:$0x3]  ;;  %v2996_v60 = vld [vmem:[%s4585_s1 + $0x10] sm:$0x3] }
  0x65   : > { %v788_v63 = vunpack.c.l.b16 %v745_v16  ;;  %v451_v13 = vor.u32 %v450_v14, %v447_v20  ;;  %v460_v27 = vrot.slane %v458_v0, 4  ;;  %v466_v7 = vrot.slane %v464_v21, 5 }
  0x66   : > { %4647 = vst [vmem:[#allocation18_spill] sm:$0xff] %v3694_v22  ;;  %2783 = vmatmul.msk.bf16.gmra.mxu2 %vm806_vm4, %v3694_v22  ;;  %v755_v59 = vsel %vm3412_vm3, %v750_v53, %v754_v6  ;;  %v2868_v5 = vrot.slane %v3422_v61, 9  ;;  %v1189_v0 = vrot.slane %v3429_v1, 5  ;;  %v1962_v21 = vsel %vm855_vm0, %v2957_v54, 0 }
  0x67   : > { %v789_v8 = vunpack.c.l.b16 %v755_v59  ;;  %v452_v2 = vrot.slane %v451_v13, 4  ;;  %v461_v20 = vor.u32 %v460_v27, %v456_v31  ;;  %v2118_v16 = vsel %vm855_vm0, %v2978_v41, 0  ;;  %1971 = vmatpush.bf16.msra.mxu2 %v1962_v21  ;;  %v3020_v21 = vld [vmem:[%s3385_s29 + $0xc] sm:$0xff] }
  0x68   : > { %v1828_v22 = vsel %vm855_vm0, %v2940_v17, 0  ;;  %v2258_v6 = vsel %vm855_vm0, %v2996_v60, 0  ;;  %v1190_v27 = vsel %vm3715_vm7, %v2868_v5, %v1189_v0  ;;  %2127 = vmatpush.bf16.msra.mxu3 %v2118_v16  ;;  %v1191_v54 = vrot.slane %v1189_v0, 4 }
  0x69   : > { %v3724_v53 = vpack.c.b16 %v789_v8, %v788_v63  ;;  %v457_v61 = vsel %vm3412_vm3, %v452_v2, %v456_v31  ;;  %v462_v13 = vrot.slane %v461_v20, 4  ;;  %1837 = vmatpush.bf16.msra.mxu1 %v1828_v22  ;;  %2267 = vmatpush.bf16.msra.mxu0 %v2258_v6  ;;  %v2869_v41 = vrot.slane %v3496_v35, 9  ;;  %v3019_v22 = vld [vmem:[%s3385_s29] sm:$0xff]  ;;  %v3761_v6 = vld [vmem:[%s3385_s29 + $0x18] sm:$0xff] }
  0x6a   : > { %v764_v1 = vunpack.c.l.b16 %v457_v61  ;;  %v1301_v31 = vunpack.c.l.b16 %v1190_v27  ;;  %v1196_v17 = vrot.slane %v3503_v43, 5  ;;  %v1199_v60 = vrot.slane %v3506_v48, 5 }
  0x6b   : > { %2787 = vmatmul.msk.bf16.gmra.mxu3 %vm806_vm4, %v3724_v53  ;;  %v467_v63 = vsel %vm3412_vm3, %v462_v13, %v466_v7  ;;  %v1193_v5 = vsel %vm3715_vm7, %v1191_v54, %v1192_v55  ;;  %v1203_v16 = vrot.slane %v3591_v56, 5  ;;  %v2870_v61 = vrot.slane %v3586_v52, 9 }
  0x6c   : > { %v765_v59 = vunpack.c.l.b16 %v467_v63  ;;  %v1302_v8 = vunpack.c.l.b16 %v1193_v5  ;;  %v1197_v35 = vsel %vm3715_vm7, %v2869_v41, %v1196_v17  ;;  %v1198_v2 = vrot.slane %v1196_v17, 4  ;;  %v3781_v41 = vld [vmem:[%s3385_s29 + $0x24] sm:$0xff] }
  0x6d   : > { %v1303_v7 = vunpack.c.l.b16 %v1197_v35  ;;  %v1205_v13 = vrot.slane %v1203_v16, 4  ;;  %v1206_v27 = vrot.slane %v3594_v57, 5  ;;  %v1210_v57 = vrot.slane %v3679_v33, 5 }
  0x6e   : > { %v3742_v20 = vpack.c.b16 %v765_v59, %v764_v1  ;;  %v1333_v0 = vpack.c.b16 %v1302_v8, %v1301_v31  ;;  %v1200_v43 = vsel %vm3715_vm7, %v1198_v2, %v1199_v60  ;;  %v2871_v63 = vrot.slane %v3672_v40, 9  ;;  %v3803_v8 = vld [vmem:[%s3385_s29 + $0x30] sm:$0xff] }
  0x6f   : > { %v1304_v48 = vunpack.c.l.b16 %v1200_v43  ;;  %v1207_v56 = vsel %vm3715_vm7, %v1205_v13, %v1206_v27  ;;  %v1212_v31 = vrot.slane %v1210_v57, 4  ;;  %v1213_v17 = vrot.slane %v3683_v39, 5  ;;  %v3831_v27 = vld [vmem:[%s3385_s29 + $0x3c] sm:$0xff] }
  0x70   : > { %2775 = vmatmul.msk.bf16.gmra.mxu0 %vm806_vm4, %v3742_v20  ;;  %v1306_v54 = vunpack.c.l.b16 %v1207_v56  ;;  %v1211_v60 = vsel %vm3715_vm7, %v2871_v63, %v1210_v57  ;;  %v1217_v39 = vrot.slane %v3391_v11, 5  ;;  %v2872_v35 = vrot.slane %v3388_v10, 9 }
  0x71   : > { %2852 = vmatmul.msk.bf16.vlgmr.msrb.gmra.mxu1 %vm806_vm4, %v3019_v22  ;;  %v3749_v55 = vpack.c.b16 %v1304_v48, %v1303_v7  ;;  %v1214_v33 = vsel %vm3715_vm7, %v1212_v31, %v1213_v17  ;;  %v1307_v59 = vunpack.c.l.b16 %v1211_v60  ;;  %v1220_v7 = vrot.slane %v3394_v12, 5 }
  0x72   : > { %v1308_v5 = vunpack.c.l.b16 %v1214_v33  ;;  %v1219_v2 = vrot.slane %v1217_v39, 4  ;;  %v1224_v13 = vrot.slane %v3451_v24, 5  ;;  %v2873_v56 = vrot.slane %v3448_v23, 9 }
  0x74   : > { %v3795_v40 = vpack.c.b16 %v1308_v5, %v1307_v59  ;;  %v1221_v11 = vsel %vm3715_vm7, %v1219_v2, %v1220_v7  ;;  %v1225_v24 = vsel %vm3715_vm7, %v2873_v56, %v1224_v13  ;;  %v1231_v5 = vrot.slane %v3521_v3, 5 }
  0x75   : > { %v1311_v23 = vunpack.c.l.b16 %v1225_v24  ;;  %v2874_v7 = vrot.slane %v3516_v58, 9  ;;  %v1238_v24 = vrot.slane %v3611_v32, 5 }
  0x76   : > { %2885 = vmatmul.msk.bf16.vlgmr.msrb.gmra.mxu2 %vm806_vm4, %v1333_v0  ;;  %v1218_v0 = vsel %vm3715_vm7, %v2872_v35, %v1217_v39  ;;  %v3865_v35 = vld [vmem:[%s3385_s29 + $0x48] sm:$0xff] }
  0x77   : > { %v1309_v48 = vunpack.c.l.b16 %v1218_v0  ;;  %4652 = vst [vmem:[#allocation21_spill] sm:$0xff] %v3865_v35  ;;  %v1233_v0 = vrot.slane %v1231_v5, 4 }
  0x7b   : > { %2906 = vmatmul.msk.bf16.vlgmr.msrb.gmra.mxu3 %vm806_vm4, %v3020_v21 }
  0x80   : > { %2923 = vmatmul.msk.bf16.vlgmr.msrb.gmra.mxu0 %vm806_vm4, %v3564_v9  ;;  %v1204_v9 = vsel %vm3715_vm7, %v2870_v61, %v1203_v16 }
  0x81   : > { %2853 = vmatmul.msk.bf16.gmra.mxu1 %vm806_vm4, %v3020_v21  ;;  %v1305_v1 = vunpack.c.l.b16 %v1204_v9  ;;  %v1310_v21 = vunpack.c.l.b16 %v1221_v11  ;;  %v1234_v11 = vrot.slane %v3528_v15, 5 }
  0x83   : > { %v3775_v52 = vpack.c.b16 %v1306_v54, %v1305_v1  ;;  %v3823_v12 = vpack.c.b16 %v1310_v21, %v1309_v48  ;;  %v1226_v1 = vrot.slane %v1224_v13, 4  ;;  %v1227_v54 = vrot.slane %v3456_v29, 5 }
  0x84   : > { %v1232_v21 = vsel %vm3715_vm7, %v2874_v7, %v1231_v5  ;;  %v1235_v13 = vsel %vm3715_vm7, %v1233_v0, %v1234_v11  ;;  %v2875_v5 = vrot.slane %v3606_v26, 9  ;;  %v1240_v7 = vrot.slane %v1238_v24, 4 }
  0x85   : > { %v1228_v63 = vsel %vm3715_vm7, %v1226_v1, %v1227_v54  ;;  %v1313_v56 = vunpack.c.l.b16 %v1232_v21  ;;  %v1314_v1 = vunpack.c.l.b16 %v1235_v13  ;;  %v1241_v0 = vrot.slane %v3616_v46, 5 }
  0x86   : > { %2886 = vmatmul.msk.bf16.gmra.mxu2 %vm806_vm4, %v3749_v55  ;;  %v1312_v60 = vunpack.c.l.b16 %v1228_v63  ;;  %v1239_v32 = vsel %vm3715_vm7, %v2875_v5, %v1238_v24  ;;  %v1245_v5 = vrot.slane %v3403_v19, 5 }
  0x87   : > { %v3889_v54 = vpack.c.b16 %v1314_v1, %v1313_v56  ;;  %v1242_v13 = vsel %vm3715_vm7, %v1240_v7, %v1241_v0  ;;  %v1315_v56 = vunpack.c.l.b16 %v1239_v32  ;;  %v3180_v32 = vld [vmem:[%s3385_s29 + $0x68] sm:$0x1] }
  0x88   : > { %v3855_v33 = vpack.c.b16 %v1312_v60, %v1311_v23  ;;  %v3899_v60 = vld [vmem:[%s3385_s29 + $0x54] sm:$0xff]  ;;  %v1316_v46 = vunpack.c.l.b16 %v1242_v13  ;;  %v1248_v13 = vrot.slane %v3180_v32, 5 }
  0x89   : > { %4655 = vst [vmem:[#allocation24_spill] sm:$0xff] %v3889_v54 }
  0x8a   : > { %4656 = vst [vmem:[#allocation25_spill] sm:$0xff] %v3899_v60 }
  0x8b   : > { %2907 = vmatmul.msk.bf16.gmra.mxu3 %vm806_vm4, %v3761_v6 }
  0x90   : > { %2924 = vmatmul.msk.bf16.gmra.mxu0 %vm806_vm4, %v3652_v45 }
  0x91   : > { %2854 = vmatmul.msk.bf16.gmra.mxu1 %vm806_vm4, %v3761_v6 }
  0x96   : > { %2887 = vmatmul.msk.bf16.gmra.mxu2 %vm806_vm4, %v3775_v52 }
  0x9b   : > { %2908 = vmatmul.msk.bf16.gmra.mxu3 %vm806_vm4, %v3781_v41 }
  0xa0   : > { %2925 = vmatmul.msk.bf16.gmra.mxu0 %vm806_vm4, %v3742_v20 }
  0xa1   : > { %2855 = vmatmul.msk.bf16.gmra.mxu1 %vm806_vm4, %v3781_v41 }
  0xa6   : > { %v3798_v22 = vpop.f32.mrf.mxu1  ;;  %2888 = vmatmul.msk.bf16.gmra.mxu2 %vm806_vm4, %v3795_v40 }
  0xab   : > { %2909 = vmatmul.msk.bf16.gmra.mxu3 %vm806_vm4, %v3803_v8 }
  0xae   : > { %v3813_v43 = vpop.f32.mrf.mxu1 }
  0xb0   : > { %v3815_v16 = vpop.f32.mrf.mxu2  ;;  %2926 = vmatmul.msk.bf16.gmra.mxu0 %vm806_vm4, %v3424_v62 }
  0xb1   : > { %2856 = vmatmul.msk.bf16.gmra.mxu1 %vm806_vm4, %v3803_v8 }
  0xb3   : > { %v3821_v10 = vpop.f32.mrf.mxu0 }
  0xb4   : > { %v3825_v61 = vpop.f32.mrf.mxu3 }
  0xb5   : > { %4650 = vst [vmem:[#allocation19_spill] sm:$0xff] %v3825_v61 }
  0xb6   : > { %2889 = vmatmul.msk.bf16.gmra.mxu2 %vm806_vm4, %v3823_v12 }
  0xb8   : > { %v3833_v9 = vpop.f32.mrf.mxu1  ;;  %v3837_v57 = vpop.f32.mrf.mxu2 }
  0xbb   : > { %2910 = vmatmul.msk.bf16.gmra.mxu3 %vm806_vm4, %v3831_v27  ;;  %v3845_v31 = vpop.f32.mrf.mxu0 }
  0xbc   : > { %v3847_v17 = vpop.f32.mrf.mxu3 }
  0xbd   : > { %4651 = vst [vmem:[#allocation20_spill] sm:$0xff] %v3847_v17 }
  0xc0   : > { %2927 = vmatmul.msk.bf16.gmra.mxu0 %vm806_vm4, %v3498_v37  ;;  %v3851_v29 = vpop.f32.mrf.mxu1 }
  0xc1   : > { %2857 = vmatmul.msk.bf16.gmra.mxu1 %vm806_vm4, %v3831_v27 }
  0xc3   : > { %v3857_v59 = vpop.f32.mrf.mxu2 }
  0xc6   : > { %2890 = vmatmul.msk.bf16.gmra.mxu2 %vm806_vm4, %v3855_v33 }
  0xc7   : > { %v3860_v39 = vpop.f32.mrf.mxu0 }
  0xc8   : > { %v3867_v2 = vpop.f32.mrf.mxu3 }
  0xc9   : > { %4653 = vst [vmem:[#allocation22_spill] sm:$0xff] %v3867_v2 }
  0xca   : > { %v3871_v48 = vpop.f32.mrf.mxu1 }
  0xcb   : > { %2911 = vmatmul.msk.bf16.gmra.mxu3 %vm806_vm4, %v3865_v35  ;;  %v3875_v3 = vpop.f32.mrf.mxu2 }
  0xcf   : > { %v3881_v58 = vpop.f32.mrf.mxu0 }
  0xd0   : > { %2928 = vmatmul.msk.bf16.gmra.mxu0 %vm806_vm4, %v3583_v44  ;;  %v3885_v15 = vpop.f32.mrf.mxu3 }
  0xd1   : > { %4654 = vst [vmem:[#allocation23_spill] sm:$0xff] %v3885_v15  ;;  %2858 = vmatmul.msk.bf16.gmra.mxu1 %vm806_vm4, %v3865_v35  ;;  %v3934_v15 = vld [vmem:[%s3385_s29 + $0x60] sm:$0xff] }
  0xd2   : > { %v3892_v63 = vpop.f32.mrf.mxu1  ;;  %4660 = vst [vmem:[#allocation29_spill] sm:$0xff] %v3934_v15 }
  0xd6   : > { %v3894_v23 = vpop.f32.mrf.mxu2  ;;  %2891 = vmatmul.msk.bf16.gmra.mxu2 %vm806_vm4, %v3889_v54 }
  0xd9   : > { %v3903_v11 = vpop.f32.mrf.mxu0 }
  0xda   : > { %v3905_v21 = vpop.f32.mrf.mxu3 }
  0xdb   : > { %4657 = vst [vmem:[#allocation26_spill] sm:$0xff] %v3905_v21  ;;  %2912 = vmatmul.msk.bf16.gmra.mxu3 %vm806_vm4, %v3899_v60  ;;  %v3921_v21 = vpack.c.b16 %v1316_v46, %v1315_v56 }
  0xdd   : > { %4658 = vst [vmem:[#allocation27_spill] sm:$0xff] %v3921_v21 }
  0xde   : > { %v3913_v26 = vpop.f32.mrf.mxu1  ;;  %v3915_v1 = vpop.f32.mrf.mxu2 }
  0xe0   : > { %2929 = vmatmul.msk.bf16.gmra.mxu0 %vm806_vm4, %v3674_v42  ;;  %v3181_v42 = vld [vmem:[%s3385_s29 + $0x60] sm:$0xf] }
  0xe1   : > { %2859 = vmatmul.msk.bf16.gmra.mxu1 %vm806_vm4, %v3899_v60  ;;  %v3923_v24 = vpop.f32.mrf.mxu0  ;;  %v2876_v2 = vrot.slane %v3181_v42, 9  ;;  %v1247_v60 = vrot.slane %v1245_v5, 4 }
  0xe2   : > { %v3926_v7 = vpop.f32.mrf.mxu3 }
  0xe3   : > { %4659 = vst [vmem:[#allocation28_spill] sm:$0xff] %v3926_v7  ;;  %v1246_v19 = vsel %vm3715_vm7, %v2876_v2, %v1245_v5  ;;  %v1249_v46 = vsel %vm3715_vm7, %v1247_v60, %v1248_v13  ;;  %v1252_v60 = vrot.slane %v3471_v47, 5 }
  0xe4   : > { %v1317_v17 = vunpack.c.l.b16 %v1246_v19  ;;  %v1318_v42 = vunpack.c.l.b16 %v1249_v46  ;;  %v3967_v19 = vld [vmem:[%s3385_s29 + $0x6c] sm:$0xff] }
  0xe6   : > { %2892 = vmatmul.msk.bf16.gmra.mxu2 %vm806_vm4, %v3921_v21  ;;  %v3930_v0 = vpop.f32.mrf.mxu1  ;;  %v3956_v2 = vpack.c.b16 %v1318_v42, %v1317_v17  ;;  %v1254_v17 = vrot.slane %v1252_v60, 4 }
  0xe8   : > { %4662 = vst [vmem:[#allocation31_spill] sm:$0xff] %v3956_v2 }
  0xe9   : > { %v3937_v56 = vpop.f32.mrf.mxu2 }
  0xeb   : > { %2913 = vmatmul.msk.bf16.gmra.mxu3 %vm806_vm4, %v3934_v15 }
  0xed   : > { %v3945_v7 = vpop.f32.mrf.mxu0 }
  0xee   : > { %v3947_v32 = vpop.f32.mrf.mxu3  ;;  %v1088_v21 = vpop.f32.mrf.mxu1 }
  0xef   : > { %4661 = vst [vmem:[#allocation30_spill] sm:$0xff] %v3947_v32  ;;  %v1089_v54 = vadd.f32 %v1088_v21, %v3821_v10  ;;  %v1255_v21 = vrot.slane %v3478_v51, 5  ;;  %v2877_v32 = vrot.slane %v3464_v38, 9 }
  0xf0   : > { %2930 = vmatmul.msk.bf16.gmra.mxu0 %vm806_vm4, %v3443_v18 }
  0xf1   : > { %v3952_v44 = vpop.f32.mrf.mxu2  ;;  %2860 = vmatmul.msk.bf16.gmra.mxu1 %vm806_vm4, %v3934_v15  ;;  %v1253_v47 = vsel %vm3715_vm7, %v2877_v32, %v1252_v60 }
  0xf2   : > { %v1319_v61 = vunpack.c.l.b16 %v1253_v47 }
  0xf5   : > { %v3959_v5 = vpop.f32.mrf.mxu0 }
  0xf6   : > { %v3961_v13 = vpop.f32.mrf.mxu3  ;;  %2893 = vmatmul.msk.bf16.gmra.mxu2 %vm806_vm4, %v3956_v2  ;;  %v1090_v10 = vpop.f32.mrf.mxu1 }
  0xf7   : > { %4663 = vst [vmem:[#allocation32_spill] sm:$0xff] %v3961_v13  ;;  %v1091_v46 = vadd.f32 %v1090_v10, %v3845_v31  ;;  %v1256_v13 = vsel %vm3715_vm7, %v1254_v17, %v1255_v21  ;;  %v1259_v21 = vrot.slane %v3543_v34, 5 }
  0xf8   : > { %v1320_v35 = vunpack.c.l.b16 %v1256_v13  ;;  %v1262_v13 = vrot.slane %v3550_v50, 5 }
  0xf9   : > { %v1409_v42 = vpop.f32.mrf.mxu2 }
  0xfa   : > { %v1489_v18 = vadd.f32 %v1409_v42, %v1089_v54  ;;  %v3984_v10 = vpack.c.b16 %v1320_v35, %v1319_v61  ;;  %v3991_v42 = vld [vmem:[%s3385_s29 + $0x78] sm:$0xff] }
  0xfb   : > { %2914 = vmatmul.msk.bf16.gmra.mxu3 %vm806_vm4, %v3967_v19 }
  0xfd   : > { %v1699_v2 = vpop.f32.mrf.mxu0 }
  0xfe   : > { %v1543_v51 = vpop.f32.mrf.mxu3  ;;  %v1093_v15 = vpop.f32.mrf.mxu1 }
  0xff   : > { %v1623_v31 = vadd.f32 %v1543_v51, %v1489_v18  ;;  %v1094_v38 = vadd.f32 %v1093_v15, %v3860_v39 }
 0x100   : > { %2931 = vmatmul.msk.bf16.gmra.mxu0 %vm806_vm4, %v3523_v4 }
 0x101   : > { %v1411_v54 = vpop.f32.mrf.mxu2  ;;  %2861 = vmatmul.msk.bf16.gmra.mxu1 %vm806_vm4, %v3967_v19  ;;  %v3982_v32 = vadd.f32 %v1699_v2, %v1623_v31  ;;  %v2878_v2 = vrot.slane %v3539_v28, 9 }
 0x102   : > { %v1490_v60 = vadd.f32 %v1411_v54, %v1091_v46  ;;  %v1261_v46 = vrot.slane %v1259_v21, 4 }
 0x103   : > { %v1260_v50 = vsel %vm3715_vm7, %v2878_v2, %v1259_v21 }
 0x104   : > { %v1263_v51 = vsel %vm3715_vm7, %v1261_v46, %v1262_v13  ;;  %v1269_v46 = vrot.slane %v3638_v49, 5 }
 0x105   : > { %v1701_v17 = vpop.f32.mrf.mxu0 }
 0x106   : > { %v1545_v18 = vpop.f32.mrf.mxu3  ;;  %2894 = vmatmul.msk.bf16.gmra.mxu2 %vm806_vm4, %v3984_v10  ;;  %v1095_v39 = vpop.f32.mrf.mxu1 }
 0x107   : > { %v1624_v15 = vadd.f32 %v1545_v18, %v1490_v60  ;;  %v1096_v47 = vadd.f32 %v1095_v39, %v3881_v58  ;;  %v1321_v58 = vunpack.c.l.b16 %v1260_v50  ;;  %v1322_v18 = vunpack.c.l.b16 %v1263_v51  ;;  %v4017_v50 = vld [vmem:[%s3385_s29 + $0x84] sm:$0xff] }
 0x109   : > { %v1414_v61 = vpop.f32.mrf.mxu2  ;;  %v3995_v35 = vadd.f32 %v1701_v17, %v1624_v15  ;;  %v4010_v13 = vpack.c.b16 %v1322_v18, %v1321_v58  ;;  %v1266_v15 = vrot.slane %v3633_v30, 5 }
 0x10a   : > { %v1491_v34 = vadd.f32 %v1414_v61, %v1094_v38 }
 0x10b   : > { %2915 = vmatmul.msk.bf16.gmra.mxu3 %vm806_vm4, %v3991_v42 }
 0x10d   : > { %v1704_v31 = vpop.f32.mrf.mxu0 }
 0x10e   : > { %v1548_v54 = vpop.f32.mrf.mxu3  ;;  %v1098_v60 = vpop.f32.mrf.mxu1 }
 0x10f   : > { %v1625_v28 = vadd.f32 %v1548_v54, %v1491_v34  ;;  %v1099_v17 = vadd.f32 %v1098_v60, %v3903_v11 }
 0x110   : > { %2932 = vmatmul.msk.bf16.gmra.mxu0 %vm806_vm4, %v3608_v25 }
 0x111   : > { %v1416_v38 = vpop.f32.mrf.mxu2  ;;  %2862 = vmatmul.msk.bf16.gmra.mxu1 %vm806_vm4, %v3991_v42  ;;  %v4008_v21 = vadd.f32 %v1704_v31, %v1625_v28  ;;  %v4664_v31 = vld [vmem:[#allocation12_spill] sm:$0xff] }
 0x112   : > { %v1492_v39 = vadd.f32 %v1416_v38, %v1096_v47  ;;  %v2879_v54 = vrot.slane %v4664_v31, 9  ;;  %v1268_v47 = vrot.slane %v1266_v15, 4 }
 0x114   : > { %v1267_v49 = vsel %vm3715_vm7, %v2879_v54, %v1266_v15  ;;  %v1270_v18 = vsel %vm3715_vm7, %v1268_v47, %v1269_v46  ;;  %v3182_v54 = vld [vmem:[%s3385_s29 + $0x94] sm:$0xf] }
 0x115   : > { %v1706_v2 = vpop.f32.mrf.mxu0  ;;  %v1273_v47 = vrot.slane %v3182_v54, 5 }
 0x116   : > { %v1550_v61 = vpop.f32.mrf.mxu3  ;;  %2895 = vmatmul.msk.bf16.gmra.mxu2 %vm806_vm4, %v4010_v13  ;;  %v1100_v11 = vpop.f32.mrf.mxu1 }
 0x117   : > { %v1626_v34 = vadd.f32 %v1550_v61, %v1492_v39  ;;  %v1101_v51 = vadd.f32 %v1100_v11, %v3923_v24  ;;  %v1323_v39 = vunpack.c.l.b16 %v1267_v49  ;;  %v1324_v61 = vunpack.c.l.b16 %v1270_v18 }
 0x119   : > { %v1419_v60 = vpop.f32.mrf.mxu2  ;;  %v4021_v58 = vadd.f32 %v1706_v2, %v1626_v34  ;;  %v4036_v31 = vpack.c.b16 %v1324_v61, %v1323_v39 }
 0x11a   : > { %v1493_v30 = vadd.f32 %v1419_v60, %v1099_v17  ;;  %v4666_v17 = vld [vmem:[#allocation18_spill] sm:$0xff] }
 0x11b   : > { %4665 = vst [vmem:[#allocation12_spill] sm:$0xff] %v4021_v58  ;;  %2916 = vmatmul.msk.bf16.gmra.mxu3 %vm806_vm4, %v4017_v50 }
 0x11c   : > { %4668 = vst [vmem:[#allocation34_spill] sm:$0xff] %v4036_v31 }
 0x11d   : > { %v1709_v28 = vpop.f32.mrf.mxu0 }
 0x11e   : > { %v1553_v24 = vpop.f32.mrf.mxu3  ;;  %v1103_v38 = vpop.f32.mrf.mxu1 }
 0x11f   : > { %v1627_v11 = vadd.f32 %v1553_v24, %v1493_v30  ;;  %v1104_v2 = vadd.f32 %v1103_v38, %v3945_v7  ;;  %v3183_v30 = vld [vmem:[%s3385_s29 + $0x98] sm:$0x1]  ;;  %v4043_v38 = vld [vmem:[%s3385_s29 + $0x90] sm:$0xff] }
 0x120   : > { %2933 = vmatmul.msk.bf16.gmra.mxu0 %vm806_vm4, %v4666_v17  ;;  %v1276_v49 = vrot.slane %v3183_v30, 5  ;;  %4669 = vst [vmem:[#allocation35_spill] sm:$0xff] %v4043_v38 }
 0x121   : > { %v1421_v34 = vpop.f32.mrf.mxu2  ;;  %2863 = vmatmul.msk.bf16.gmra.mxu1 %vm806_vm4, %v4017_v50  ;;  %v4034_v15 = vadd.f32 %v1709_v28, %v1627_v11  ;;  %v3184_v28 = vld [vmem:[%s3385_s29 + $0x90] sm:$0xf] }
 0x122   : > { %v1494_v46 = vadd.f32 %v1421_v34, %v1101_v51  ;;  %v2880_v11 = vrot.slane %v3184_v28, 9  ;;  %v1275_v51 = vrot.slane %v1273_v47, 4 }
 0x123   : > { %4667 = vst [vmem:[#allocation33_spill] sm:$0xff] %v4034_v15 }
 0x124   : > { %v1274_v54 = vsel %vm3715_vm7, %v2880_v11, %v1273_v47  ;;  %v3185_v11 = vld [vmem:[%s3385_s29 + $0xa0] sm:$0xf] }
 0x125   : > { %v1711_v60 = vpop.f32.mrf.mxu0 }
 0x126   : > { %v1555_v7 = vpop.f32.mrf.mxu3  ;;  %2896 = vmatmul.msk.bf16.gmra.mxu2 %vm806_vm4, %v4036_v31  ;;  %v1105_v18 = vpop.f32.mrf.mxu1  ;;  %v3187_v31 = vld [vmem:[%s3385_s29 + $0x9c] sm:$0xf] }
 0x127   : > { %v1628_v24 = vadd.f32 %v1555_v7, %v1494_v46  ;;  %v1106_v58 = vadd.f32 %v1105_v18, %v3959_v5  ;;  %v1277_v46 = vsel %vm3715_vm7, %v1275_v51, %v1276_v49  ;;  %v1325_v18 = vunpack.c.l.b16 %v1274_v54 }
 0x128   : > { %v1326_v28 = vunpack.c.l.b16 %v1277_v46  ;;  %v1280_v51 = vrot.slane %v3185_v11, 5  ;;  %v3186_v46 = vld [vmem:[%s3385_s29 + $0xa4] sm:$0x1] }
 0x129   : > { %v1424_v39 = vpop.f32.mrf.mxu2  ;;  %v4047_v61 = vadd.f32 %v1711_v60, %v1628_v24  ;;  %v4671_v60 = vld [vmem:[#allocation6_spill] sm:$0xff] }
 0x12a   : > { %v1495_v34 = vadd.f32 %v1424_v39, %v1104_v2  ;;  %v4061_v49 = vpack.c.b16 %v1326_v28, %v1325_v18 }
 0x12b   : > { %4670 = vst [vmem:[#allocation36_spill] sm:$0xff] %v4047_v61  ;;  %2917 = vmatmul.msk.bf16.gmra.mxu3 %vm806_vm4, %v4043_v38 }
 0x12c   : > { %4673 = vst [vmem:[#allocation38_spill] sm:$0xff] %v4061_v49 }
 0x12d   : > { %v1714_v30 = vpop.f32.mrf.mxu0 }
 0x12e   : > { %v1558_v7 = vpop.f32.mrf.mxu3  ;;  %v1108_v5 = vpop.f32.mrf.mxu1 }
 0x12f   : > { %v1629_v15 = vadd.f32 %v1558_v7, %v1495_v34  ;;  %v1283_v7 = vrot.slane %v3186_v46, 5 }
 0x130   : > { %2934 = vmatmul.msk.bf16.gmra.mxu0 %vm806_vm4, %v4671_v60  ;;  %v4068_v60 = vld [vmem:[%s3385_s29 + $0x9c] sm:$0xff] }
 0x131   : > { %v1426_v2 = vpop.f32.mrf.mxu2  ;;  %2864 = vmatmul.msk.bf16.gmra.mxu1 %vm806_vm4, %v4043_v38  ;;  %v4059_v47 = vadd.f32 %v1714_v30, %v1629_v15  ;;  %4674 = vst [vmem:[#allocation39_spill] sm:$0xff] %v4068_v60  ;;  %v2881_v38 = vrot.slane %v3187_v31, 9  ;;  %v1282_v15 = vrot.slane %v1280_v51, 4 }
 0x132   : > { %v1496_v24 = vadd.f32 %v1426_v2, %v1106_v58  ;;  %v1109_v58 = vadd.f32 %v1108_v5, %v3798_v22  ;;  %v4676_v5 = vld [vmem:[#allocation7_spill] sm:$0xff] }
 0x133   : > { %4672 = vst [vmem:[#allocation37_spill] sm:$0xff] %v4059_v47  ;;  %v1281_v2 = vsel %vm3715_vm7, %v2881_v38, %v1280_v51 }
 0x134   : > { %v1327_v31 = vunpack.c.l.b16 %v1281_v2 }
 0x135   : > { %v1716_v39 = vpop.f32.mrf.mxu0 }
 0x136   : > { %v1560_v54 = vpop.f32.mrf.mxu3  ;;  %2897 = vmatmul.msk.bf16.gmra.mxu2 %vm806_vm4, %v4061_v49  ;;  %v1110_v34 = vpop.f32.mrf.mxu1 }
 0x137   : > { %v1630_v61 = vadd.f32 %v1560_v54, %v1496_v24  ;;  %v1284_v24 = vsel %vm3715_vm7, %v1282_v15, %v1283_v7  ;;  %v4679_v15 = vld [vmem:[#allocation9_spill] sm:$0xff] }
 0x138   : > { %v1328_v47 = vunpack.c.l.b16 %v1284_v24  ;;  %v4680_v24 = vld [vmem:[#allocation10_spill] sm:$0xff] }
 0x139   : > { %v1429_v30 = vpop.f32.mrf.mxu2  ;;  %v4072_v18 = vadd.f32 %v1716_v39, %v1630_v61  ;;  %v1111_v61 = vadd.f32 %v1110_v34, %v3813_v43  ;;  %v4094_v34 = vld [vmem:[%s3385_s29 + $0xa8] sm:$0xff] }
 0x13a   : > { %v1497_v28 = vadd.f32 %v1429_v30, %v1109_v58  ;;  %v4087_v7 = vpack.c.b16 %v1328_v47, %v1327_v31  ;;  %v1287_v58 = vrot.slane %v4679_v15, 5  ;;  %4681 = vst [vmem:[#allocation9_spill] sm:$0xff] %v4094_v34 }
 0x13b   : > { %4675 = vst [vmem:[#allocation40_spill] sm:$0xff] %v4072_v18  ;;  %2918 = vmatmul.msk.bf16.gmra.mxu3 %vm806_vm4, %v4068_v60  ;;  %v4682_v18 = vld [vmem:[#allocation8_spill] sm:$0xff] }
 0x13c   : > { %4678 = vst [vmem:[#allocation42_spill] sm:$0xff] %v4087_v7 }
 0x13d   : > { %v1719_v11 = vpop.f32.mrf.mxu0 }
 0x13e   : > { %v1563_v54 = vpop.f32.mrf.mxu3  ;;  %v1113_v46 = vpop.f32.mrf.mxu1 }
 0x13f   : > { %v1631_v22 = vadd.f32 %v1563_v54, %v1497_v28  ;;  %v1290_v54 = vrot.slane %v4680_v24, 5 }
 0x140   : > { %2935 = vmatmul.msk.bf16.gmra.mxu0 %vm806_vm4, %v4676_v5  ;;  %v2882_v5 = vrot.slane %v4682_v18, 9 }
 0x141   : > { %v1431_v39 = vpop.f32.mrf.mxu2  ;;  %2865 = vmatmul.msk.bf16.gmra.mxu1 %vm806_vm4, %v4068_v60  ;;  %v4085_v38 = vadd.f32 %v1719_v11, %v1631_v22  ;;  %v1289_v11 = vrot.slane %v1287_v58, 4  ;;  %v1114_v22 = vadd.f32 %v1113_v46, %v3833_v9 }
 0x142   : > { %v1498_v51 = vadd.f32 %v1431_v39, %v1111_v61  ;;  %v1288_v39 = vsel %vm3715_vm7, %v2882_v5, %v1287_v58  ;;  %v4112_v5 = vld [vmem:[%s3385_s29 + $0xc0] sm:$0xf] }
 0x143   : > { %4677 = vst [vmem:[#allocation41_spill] sm:$0xff] %v4085_v38  ;;  %v1329_v24 = vunpack.c.l.b16 %v1288_v39  ;;  %v4684_v38 = vld [vmem:[#allocation13_spill] sm:$0xff]  ;;  %v1656_v39 = vshrl.u32 %v4112_v5, 16 }
 0x144   : > { %4685 = vst [vmem:[#allocation8_spill] sm:$0xff] %v4112_v5 }
 0x145   : > { %v1721_v30 = vpop.f32.mrf.mxu0 }
 0x146   : > { %v1565_v2 = vpop.f32.mrf.mxu3  ;;  %2898 = vmatmul.msk.bf16.gmra.mxu2 %vm806_vm4, %v4087_v7  ;;  %v1115_v28 = vpop.f32.mrf.mxu1 }
 0x147   : > { %v1632_v43 = vadd.f32 %v1565_v2, %v1498_v51  ;;  %v1291_v51 = vsel %vm3715_vm7, %v1289_v11, %v1290_v54 }
 0x148   : > { %v1330_v9 = vunpack.c.l.b16 %v1291_v51 }
 0x149   : > { %v1434_v47 = vpop.f32.mrf.mxu2  ;;  %v4098_v31 = vadd.f32 %v1721_v30, %v1632_v43  ;;  %v1116_v30 = vadd.f32 %v1115_v28, %v3851_v29  ;;  %v1659_v29 = vshll.u32 %v4112_v5, 16 }
 0x14a   : > { %v1499_v61 = vadd.f32 %v1434_v47, %v1114_v22  ;;  %v4116_v11 = vpack.c.b16 %v1330_v9, %v1329_v24  ;;  %v4119_v22 = vld [vmem:[%s3385_s29 + $0xc4] sm:$0xf]  ;;  %v4689_v47 = vld [vmem:[#allocation15_spill] sm:$0xff]  ;;  %v4690_v24 = vld [vmem:[#allocation16_spill] sm:$0xff] }
 0x14b   : > { %4683 = vst [vmem:[#allocation10_spill] sm:$0xff] %v4098_v31  ;;  %2919 = vmatmul.msk.bf16.gmra.mxu3 %vm806_vm4, %v4094_v34  ;;  %v1665_v28 = vshll.u32 %v4119_v22, 16  ;;  %v1297_v9 = vrot.slane %v4690_v24, 5  ;;  %v1661_v7 = vrot.slane %v1659_v29, 5 }
 0x14c   : > { %4687 = vst [vmem:[#allocation44_spill] sm:$0xff] %v4116_v11 }
 0x14d   : > { %v1724_v15 = vpop.f32.mrf.mxu0  ;;  %4688 = vst [vmem:[#allocation45_spill] sm:$0xff] %v4119_v22 }
 0x14e   : > { %v1568_v18 = vpop.f32.mrf.mxu3  ;;  %v1118_v2 = vpop.f32.mrf.mxu1 }
 0x14f   : > { %v1633_v46 = vadd.f32 %v1568_v18, %v1499_v61  ;;  %v1294_v61 = vrot.slane %v4689_v47, 5  ;;  %v1669_v18 = vshrl.u32 %v4119_v22, 16  ;;  %v1119_v5 = vadd.f32 %v1118_v2, %v3871_v48 }
 0x150   : > { %2936 = vmatmul.msk.bf16.gmra.mxu0 %vm806_vm4, %v4684_v38  ;;  %v1658_v38 = vrot.slane %v1656_v39, 4  ;;  %v1667_v22 = vrot.slane %v1665_v28, 5 }
 0x151   : > { %v1436_v43 = vpop.f32.mrf.mxu2  ;;  %2866 = vmatmul.msk.bf16.gmra.mxu1 %vm806_vm4, %v4094_v34  ;;  %v4114_v58 = vadd.f32 %v1724_v15, %v1633_v46  ;;  %v1671_v60 = vrot.slane %v1669_v18, 4 }
 0x152   : > { %v1500_v54 = vadd.f32 %v1436_v43, %v1116_v30  ;;  %v4130_v30 = vld [vmem:[%s3385_s29 + $0xb4] sm:$0xff]  ;;  %v4691_v43 = vld [vmem:[#allocation14_spill] sm:$0xff]  ;;  %v1662_v2 = vor.u32 %v1661_v7, %v1658_v38 }
 0x153   : > { %4686 = vst [vmem:[#allocation43_spill] sm:$0xff] %v4114_v58  ;;  %v2883_v47 = vrot.slane %v4691_v43, 9  ;;  %v1296_v58 = vrot.slane %v1294_v61, 4  ;;  %v1672_v39 = vor.u32 %v1671_v60, %v1667_v22 }
 0x155   : > { %v1726_v51 = vpop.f32.mrf.mxu0  ;;  %v1673_v38 = vrot.slane %v1672_v39, 4 }
 0x156   : > { %v1570_v31 = vpop.f32.mrf.mxu3  ;;  %2899 = vmatmul.msk.bf16.gmra.mxu2 %vm806_vm4, %v4116_v11  ;;  %v1120_v15 = vpop.f32.mrf.mxu1  ;;  %v4137_v11 = vld [vmem:[%s3385_s29 + $0xc8] sm:$0x1] }
 0x157   : > { %v1634_v46 = vadd.f32 %v1570_v31, %v1500_v54  ;;  %v1295_v31 = vsel %vm3715_vm7, %v2883_v47, %v1294_v61  ;;  %v1298_v54 = vsel %vm3715_vm7, %v1296_v58, %v1297_v9  ;;  %v1675_v29 = vshll.u32 %v4137_v11, 16 }
 0x158   : > { %v1331_v18 = vunpack.c.l.b16 %v1295_v31  ;;  %v1121_v24 = vadd.f32 %v1120_v15, %v3892_v63  ;;  %v1663_v58 = vrot.slane %v1662_v2, 4 }
 0x159   : > { %v1439_v34 = vpop.f32.mrf.mxu2  ;;  %v4134_v49 = vadd.f32 %v1726_v51, %v1634_v46  ;;  %v1677_v60 = vrot.slane %v1675_v29, 5 }
 0x15a   : > { %v1501_v17 = vadd.f32 %v1439_v34, %v1119_v5  ;;  %v1332_v34 = vunpack.c.l.b16 %v1298_v54  ;;  %v4162_v54 = vld [vmem:[%s3385_s29 + $0xc0] sm:$0xff] }
 0x15b   : > { %2920 = vmatmul.msk.bf16.gmra.mxu3 %vm806_vm4, %v4130_v30  ;;  %v1678_v63 = vsel %vm3412_vm3, %v1673_v38, %v1677_v60 }
 0x15c   : > { %v4153_v46 = vpack.c.b16 %v1332_v34, %v1331_v18  ;;  %v1682_v39 = vunpack.c.l.b16 %v1678_v63 }
 0x15d   : > { %v1729_v48 = vpop.f32.mrf.mxu0 }
 0x15e   : > { %v1573_v28 = vpop.f32.mrf.mxu3  ;;  %v1123_v51 = vpop.f32.mrf.mxu1 }
 0x15f   : > { %v1635_v5 = vadd.f32 %v1573_v28, %v1501_v17  ;;  %v1668_v17 = vsel %vm3412_vm3, %v1663_v58, %v1667_v22 }
 0x160   : > { %2937 = vmatmul.msk.bf16.gmra.mxu0 %vm806_vm4, %v3724_v53  ;;  %v1681_v2 = vunpack.c.l.b16 %v1668_v17 }
 0x161   : > { %v1441_v61 = vpop.f32.mrf.mxu2  ;;  %2867 = vmatmul.msk.bf16.gmra.mxu1 %vm806_vm4, %v4130_v30  ;;  %v4151_v7 = vadd.f32 %v1729_v48, %v1635_v5  ;;  %v1124_v48 = vadd.f32 %v1123_v51, %v3913_v26 }
 0x162   : > { %v1502_v9 = vadd.f32 %v1441_v61, %v1121_v24  ;;  %v4169_v22 = vpack.c.b16 %v1682_v39, %v1681_v2 }
 0x165   : > { %v1731_v43 = vpop.f32.mrf.mxu0 }
 0x166   : > { %v1575_v15 = vpop.f32.mrf.mxu3  ;;  %2900 = vmatmul.msk.bf16.gmra.mxu2 %vm806_vm4, %v4153_v46  ;;  %v1125_v47 = vpop.f32.mrf.mxu1 }
 0x167   : > { %v1636_v31 = vadd.f32 %v1575_v15, %v1502_v9  ;;  %v1126_v26 = vadd.f32 %v1125_v47, %v3930_v0 }
 0x169   : > { %v1444_v29 = vpop.f32.mrf.mxu2  ;;  %v4165_v28 = vadd.f32 %v1731_v43, %v1636_v31 }
 0x16a   : > { %v1503_v18 = vadd.f32 %v1444_v29, %v1124_v48 }
 0x16b   : > { %2921 = vmatmul.msk.bf16.gmra.mxu3 %vm806_vm4, %v4162_v54 }
 0x16d   : > { %v1734_v34 = vpop.f32.mrf.mxu0 }
 0x16e   : > { %v1578_v5 = vpop.f32.mrf.mxu3  ;;  %v1128_v24 = vpop.f32.mrf.mxu1 }
 0x16f   : > { %v1637_v61 = vadd.f32 %v1578_v5, %v1503_v18  ;;  %v1129_v63 = vadd.f32 %v1128_v24, %v3815_v16 }
 0x170   : > { %2938 = vmatmul.msk.bf16.gmra.mxu0 %vm806_vm4, %v4169_v22 }
 0x171   : > { %v1446_v51 = vpop.f32.mrf.mxu2  ;;  %2941 = vmatmul.msk.bf16.vlgmr.msra.gmra.mxu1 %vm806_vm4, %v3749_v55  ;;  %v4176_v58 = vadd.f32 %v1734_v34, %v1637_v61 }
 0x172   : > { %v1504_v38 = vadd.f32 %v1446_v51, %v1126_v26 }
 0x175   : > { %v1736_v60 = vpop.f32.mrf.mxu0 }
 0x176   : > { %v1580_v9 = vpop.f32.mrf.mxu3  ;;  %2962 = vmatmul.msk.bf16.vlgmr.msra.gmra.mxu2 %vm806_vm4, %v3761_v6  ;;  %v1130_v43 = vpop.f32.mrf.mxu1 }
 0x177   : > { %v1638_v17 = vadd.f32 %v1580_v9, %v1504_v38  ;;  %v1131_v6 = vadd.f32 %v1130_v43, %v3837_v57 }
 0x179   : > { %v1449_v15 = vpop.f32.mrf.mxu2  ;;  %v4181_v31 = vadd.f32 %v1736_v60, %v1638_v17 }
 0x17a   : > { %v1505_v0 = vadd.f32 %v1449_v15, %v1129_v63 }
 0x17b   : > { %2979 = vmatmul.msk.bf16.vlgmr.msra.gmra.mxu3 %vm806_vm4, %v3652_v45 }
 0x17d   : > { %v1739_v55 = vpop.f32.mrf.mxu0 }
 0x17e   : > { %v1583_v47 = vpop.f32.mrf.mxu3  ;;  %v1133_v48 = vpop.f32.mrf.mxu1 }
 0x17f   : > { %v1639_v2 = vadd.f32 %v1583_v47, %v1505_v0  ;;  %v1134_v24 = vadd.f32 %v1133_v48, %v3857_v59 }
 0x180   : > { %2997 = vmatmul.msk.bf16.vlgmr.msra.gmra.mxu0 %vm806_vm4, %v3775_v52 }
 0x181   : > { %v1451_v39 = vpop.f32.mrf.mxu2  ;;  %2942 = vmatmul.msk.bf16.gmra.mxu1 %vm806_vm4, %v3775_v52  ;;  %v4190_v16 = vadd.f32 %v1739_v55, %v1639_v2 }
 0x182   : > { %v1506_v29 = vadd.f32 %v1451_v39, %v1131_v6 }
 0x185   : > { %v1741_v18 = vpop.f32.mrf.mxu0 }
 0x186   : > { %v1585_v34 = vpop.f32.mrf.mxu3  ;;  %2963 = vmatmul.msk.bf16.gmra.mxu2 %vm806_vm4, %v3781_v41  ;;  %v1135_v45 = vpop.f32.mrf.mxu1 }
 0x187   : > { %v1640_v5 = vadd.f32 %v1585_v34, %v1506_v29  ;;  %v1136_v41 = vadd.f32 %v1135_v45, %v3875_v3 }
 0x189   : > { %v1454_v61 = vpop.f32.mrf.mxu2  ;;  %v4195_v26 = vadd.f32 %v1741_v18, %v1640_v5 }
 0x18a   : > { %v1507_v57 = vadd.f32 %v1454_v61, %v1134_v24 }
 0x18b   : > { %2980 = vmatmul.msk.bf16.gmra.mxu3 %vm806_vm4, %v3742_v20 }
 0x18d   : > { %v1744_v52 = vpop.f32.mrf.mxu0 }
 0x18e   : > { %v1588_v51 = vpop.f32.mrf.mxu3  ;;  %v1138_v38 = vpop.f32.mrf.mxu1 }
 0x18f   : > { %v1641_v60 = vadd.f32 %v1588_v51, %v1507_v57  ;;  %v1139_v0 = vadd.f32 %v1138_v38, %v3894_v23 }
 0x190   : > { %2998 = vmatmul.msk.bf16.gmra.mxu0 %vm806_vm4, %v3795_v40 }
 0x191   : > { %v1456_v9 = vpop.f32.mrf.mxu2  ;;  %2943 = vmatmul.msk.bf16.gmra.mxu1 %vm806_vm4, %v3795_v40  ;;  %v4204_v59 = vadd.f32 %v1744_v52, %v1641_v60 }
 0x192   : > { %v1508_v43 = vadd.f32 %v1456_v9, %v1136_v41 }
 0x195   : > { %v1746_v17 = vpop.f32.mrf.mxu0 }
 0x196   : > { %v1590_v63 = vpop.f32.mrf.mxu3  ;;  %2964 = vmatmul.msk.bf16.gmra.mxu2 %vm806_vm4, %v3803_v8  ;;  %v1140_v20 = vpop.f32.mrf.mxu1 }
 0x197   : > { %v1642_v15 = vadd.f32 %v1590_v63, %v1508_v43  ;;  %v1141_v8 = vadd.f32 %v1140_v20, %v3915_v1  ;;  %v4692_v43 = vld [vmem:[#allocation21_spill] sm:$0xff]  ;;  %v4693_v63 = vld [vmem:[#allocation19_spill] sm:$0xff] }
 0x199   : > { %v1459_v55 = vpop.f32.mrf.mxu2  ;;  %v4209_v47 = vadd.f32 %v1746_v17, %v1642_v15 }
 0x19a   : > { %v1509_v3 = vadd.f32 %v1459_v55, %v1139_v0  ;;  %v4694_v55 = vld [vmem:[#allocation11_spill] sm:$0xff] }
 0x19b   : > { %2981 = vmatmul.msk.bf16.gmra.mxu3 %vm806_vm4, %v3424_v62 }
 0x19d   : > { %v1749_v40 = vpop.f32.mrf.mxu0 }
 0x19e   : > { %v1593_v48 = vpop.f32.mrf.mxu3  ;;  %v1143_v2 = vpop.f32.mrf.mxu1 }
 0x19f   : > { %v1643_v6 = vadd.f32 %v1593_v48, %v1509_v3  ;;  %v1144_v5 = vadd.f32 %v1143_v2, %v3937_v56  ;;  %v4695_v2 = vld [vmem:[#allocation24_spill] sm:$0xff] }
 0x1a0   : > { %2999 = vmatmul.msk.bf16.gmra.mxu0 %vm806_vm4, %v3823_v12 }
 0x1a1   : > { %v1461_v39 = vpop.f32.mrf.mxu2  ;;  %2944 = vmatmul.msk.bf16.gmra.mxu1 %vm806_vm4, %v3823_v12  ;;  %v4218_v23 = vadd.f32 %v1749_v40, %v1643_v6  ;;  %v4696_v6 = vld [vmem:[#allocation20_spill] sm:$0xff] }
 0x1a2   : > { %v1510_v29 = vadd.f32 %v1461_v39, %v1141_v8 }
 0x1a5   : > { %v1751_v18 = vpop.f32.mrf.mxu0 }
 0x1a6   : > { %v1595_v34 = vpop.f32.mrf.mxu3  ;;  %2965 = vmatmul.msk.bf16.gmra.mxu2 %vm806_vm4, %v3831_v27  ;;  %v1145_v62 = vpop.f32.mrf.mxu1 }
 0x1a7   : > { %v1644_v45 = vadd.f32 %v1595_v34, %v1510_v29  ;;  %v1146_v27 = vadd.f32 %v1145_v62, %v3952_v44 }
 0x1a9   : > { %v1464_v24 = vpop.f32.mrf.mxu2  ;;  %v4223_v61 = vadd.f32 %v1751_v18, %v1644_v45  ;;  %v4697_v45 = vld [vmem:[#allocation25_spill] sm:$0xff] }
 0x1aa   : > { %v1511_v1 = vadd.f32 %v1464_v24, %v1144_v5 }
 0x1ab   : > { %2982 = vmatmul.msk.bf16.gmra.mxu3 %vm806_vm4, %v3498_v37 }
 0x1ad   : > { %v1754_v12 = vpop.f32.mrf.mxu0 }
 0x1ae   : > { %v1598_v57 = vpop.f32.mrf.mxu3  ;;  %v1148_v52 = vpop.f32.mrf.mxu1 }
 0x1af   : > { %v1645_v51 = vadd.f32 %v1598_v57, %v1511_v1  ;;  %v1149_v20 = vadd.f32 %v1148_v52, %v4693_v63  ;;  %v4698_v1 = vld [vmem:[#allocation22_spill] sm:$0xff] }
 0x1b0   : > { %3000 = vmatmul.msk.bf16.gmra.mxu0 %vm806_vm4, %v3855_v33 }
 0x1b1   : > { %v1466_v38 = vpop.f32.mrf.mxu2  ;;  %2945 = vmatmul.msk.bf16.gmra.mxu1 %vm806_vm4, %v3855_v33  ;;  %v4232_v56 = vadd.f32 %v1754_v12, %v1645_v51 }
 0x1b2   : > { %v1512_v60 = vadd.f32 %v1466_v38, %v1146_v27  ;;  %v4699_v27 = vld [vmem:[#allocation17_spill] sm:$0xff] }
 0x1b5   : > { %v1756_v41 = vpop.f32.mrf.mxu0 }
 0x1b6   : > { %v1600_v9 = vpop.f32.mrf.mxu3  ;;  %2966 = vmatmul.msk.bf16.gmra.mxu2 %vm806_vm4, %v4692_v43  ;;  %v1150_v37 = vpop.f32.mrf.mxu1  ;;  %v4700_v43 = vld [vmem:[#allocation27_spill] sm:$0xff] }
 0x1b7   : > { %v1646_v17 = vadd.f32 %v1600_v9, %v1512_v60  ;;  %v1151_v8 = vadd.f32 %v1150_v37, %v4696_v6  ;;  %v4701_v37 = vld [vmem:[#allocation23_spill] sm:$0xff] }
 0x1b9   : > { %v1469_v15 = vpop.f32.mrf.mxu2  ;;  %v4237_v0 = vadd.f32 %v1756_v41, %v1646_v17 }
 0x1ba   : > { %v1513_v44 = vadd.f32 %v1469_v15, %v1149_v20 }
 0x1bb   : > { %2983 = vmatmul.msk.bf16.gmra.mxu3 %vm806_vm4, %v4694_v55 }
 0x1bd   : > { %v1759_v33 = vpop.f32.mrf.mxu0 }
 0x1be   : > { %v1603_v3 = vpop.f32.mrf.mxu3  ;;  %v1153_v40 = vpop.f32.mrf.mxu1 }
 0x1bf   : > { %v1647_v48 = vadd.f32 %v1603_v3, %v1513_v44  ;;  %v1154_v12 = vadd.f32 %v1153_v40, %v4698_v1  ;;  %v4706_v1 = vld [vmem:[#allocation28_spill] sm:$0xff] }
 0x1c0   : > { %3001 = vmatmul.msk.bf16.gmra.mxu0 %vm806_vm4, %v4695_v2 }
 0x1c1   : > { %v1471_v39 = vpop.f32.mrf.mxu2  ;;  %2946 = vmatmul.msk.bf16.gmra.mxu1 %vm806_vm4, %v4695_v2  ;;  %v4246_v29 = vadd.f32 %v1759_v33, %v1647_v48  ;;  %v4702_v33 = vld [vmem:[#allocation29_spill] sm:$0xff]  ;;  %v4703_v48 = vld [vmem:[#allocation26_spill] sm:$0xff] }
 0x1c2   : > { %v1514_v18 = vadd.f32 %v1471_v39, %v1151_v8 }
 0x1c5   : > { %v1761_v34 = vpop.f32.mrf.mxu0 }
 0x1c6   : > { %v1605_v62 = vpop.f32.mrf.mxu3  ;;  %2967 = vmatmul.msk.bf16.gmra.mxu2 %vm806_vm4, %v4697_v45  ;;  %v1155_v5 = vpop.f32.mrf.mxu1 }
 0x1c7   : > { %v1648_v24 = vadd.f32 %v1605_v62, %v1514_v18  ;;  %v1156_v17 = vadd.f32 %v1155_v5, %v4701_v37  ;;  %v4704_v18 = vld [vmem:[#allocation5_spill] sm:$0xff] }
 0x1c9   : > { %v1474_v57 = vpop.f32.mrf.mxu2  ;;  %v4251_v52 = vadd.f32 %v1761_v34, %v1648_v24  ;;  %v4705_v24 = vld [vmem:[#allocation31_spill] sm:$0xff] }
 0x1ca   : > { %v1515_v51 = vadd.f32 %v1474_v57, %v1154_v12 }
 0x1cb   : > { %2984 = vmatmul.msk.bf16.gmra.mxu3 %vm806_vm4, %v4699_v27 }
 0x1cd   : > { %v1764_v38 = vpop.f32.mrf.mxu0 }
 0x1ce   : > { %v1608_v60 = vpop.f32.mrf.mxu3  ;;  %v1158_v41 = vpop.f32.mrf.mxu1 }
 0x1cf   : > { %v1649_v9 = vadd.f32 %v1608_v60, %v1515_v51  ;;  %v1159_v2 = vadd.f32 %v1158_v41, %v4703_v48 }
 0x1d0   : > { %3002 = vmatmul.msk.bf16.gmra.mxu0 %vm806_vm4, %v4700_v43 }
 0x1d1   : > { %v1476_v63 = vpop.f32.mrf.mxu2  ;;  %2947 = vmatmul.msk.bf16.gmra.mxu1 %vm806_vm4, %v4700_v43  ;;  %v4260_v20 = vadd.f32 %v1764_v38, %v1649_v9  ;;  %v4707_v43 = vld [vmem:[#allocation30_spill] sm:$0xff] }
 0x1d2   : > { %v1516_v15 = vadd.f32 %v1476_v63, %v1156_v17 }
 0x1d5   : > { %v1766_v44 = vpop.f32.mrf.mxu0 }
 0x1d6   : > { %v1610_v55 = vpop.f32.mrf.mxu3  ;;  %2968 = vmatmul.msk.bf16.gmra.mxu2 %vm806_vm4, %v4702_v33  ;;  %v1160_v3 = vpop.f32.mrf.mxu1 }
 0x1d7   : > { %v1650_v40 = vadd.f32 %v1610_v55, %v1516_v15  ;;  %v1161_v12 = vadd.f32 %v1160_v3, %v4706_v1 }
 0x1d9   : > { %v1479_v6 = vpop.f32.mrf.mxu2  ;;  %v4265_v8 = vadd.f32 %v1766_v44, %v1650_v40 }
 0x1da   : > { %v1517_v39 = vadd.f32 %v1479_v6, %v1159_v2 }
 0x1db   : > { %2985 = vmatmul.msk.bf16.gmra.mxu3 %vm806_vm4, %v4704_v18 }
 0x1dd   : > { %v1769_v34 = vpop.f32.mrf.mxu0 }
 0x1de   : > { %v1613_v62 = vpop.f32.mrf.mxu3  ;;  %v1163_v45 = vpop.f32.mrf.mxu1 }
 0x1df   : > { %v1651_v5 = vadd.f32 %v1613_v62, %v1517_v39  ;;  %v1164_v37 = vadd.f32 %v1163_v45, %v4707_v43 }
 0x1e0   : > { %3003 = vmatmul.msk.bf16.gmra.mxu0 %vm806_vm4, %v4705_v24 }
 0x1e1   : > { %v1481_v57 = vpop.f32.mrf.mxu2  ;;  %2948 = vmatmul.msk.bf16.gmra.mxu1 %vm806_vm4, %v4705_v24  ;;  %v4274_v51 = vadd.f32 %v1769_v34, %v1651_v5 }
 0x1e2   : > { %v1518_v27 = vadd.f32 %v1481_v57, %v1161_v12  ;;  %v4306_v12 = vld [vmem:[%s4586_s2] ss:$0 sm:$0xff] }
 0x1e5   : > { %v1771_v38 = vpop.f32.mrf.mxu0 }
 0x1e6   : > { %v1615_v60 = vpop.f32.mrf.mxu3  ;;  %2969 = vmatmul.msk.bf16.gmra.mxu2 %vm806_vm4, %v3967_v19  ;;  %v1165_v41 = vpop.f32.mrf.mxu1  ;;  %v4708_v19 = vld [vmem:[#allocation32_spill] sm:$0xff] }
 0x1e7   : > { %v1652_v9 = vadd.f32 %v1615_v60, %v1518_v27  ;;  %v1166_v40 = vadd.f32 %v1165_v41, %v4708_v19  ;;  %v4314_v27 = vld [vmem:[%s4587_s3] ss:$0 sm:$0xff] }
 0x1e9   : > { %v1484_v17 = vpop.f32.mrf.mxu2  ;;  %v4279_v63 = vadd.f32 %v1771_v38, %v1652_v9 }
 0x1ea   : > { %v1519_v15 = vadd.f32 %v1484_v17, %v1164_v37 }
 0x1eb   : > { %2986 = vmatmul.msk.bf16.gmra.mxu3 %vm806_vm4, %v3523_v4 }
 0x1ed   : > { %v1774_v44 = vpop.f32.mrf.mxu0 }
 0x1ee   : > { %v1618_v55 = vpop.f32.mrf.mxu3  ;;  %v1839_v33 = vpop.f32.mrf.mxu1 }
 0x1ef   : > { %v1653_v3 = vadd.f32 %v1618_v55, %v1519_v15  ;;  %v1919_v62 = vadd.f32 %v1839_v33, %v3982_v32 }
 0x1f0   : > { %3004 = vmatmul.msk.bf16.gmra.mxu0 %vm806_vm4, %v3984_v10 }
 0x1f1   : > { %v1486_v48 = vpop.f32.mrf.mxu2  ;;  %2949 = vmatmul.msk.bf16.gmra.mxu1 %vm806_vm4, %v3984_v10  ;;  %v4288_v2 = vadd.f32 %v1774_v44, %v1653_v3 }
 0x1f2   : > { %v1520_v6 = vadd.f32 %v1486_v48, %v1166_v40 }
 0x1f5   : > { %v1776_v39 = vpop.f32.mrf.mxu0 }
 0x1f6   : > { %v1620_v18 = vpop.f32.mrf.mxu3  ;;  %2970 = vmatmul.msk.bf16.gmra.mxu2 %vm806_vm4, %v3991_v42  ;;  %v1841_v4 = vpop.f32.mrf.mxu1 }
 0x1f7   : > { %v1654_v34 = vadd.f32 %v1620_v18, %v1520_v6  ;;  %v1920_v38 = vadd.f32 %v1841_v4, %v3995_v35  ;;  %v4709_v6 = vld [vmem:[#allocation18_spill] sm:$0xff] }
 0x1f9   : > { %v1973_v45 = vpop.f32.mrf.mxu2  ;;  %v4293_v5 = vadd.f32 %v1776_v39, %v1654_v34 }
 0x1fa   : > { %v2053_v10 = vadd.f32 %v1973_v45, %v1919_v62  ;;  %v4710_v45 = vld [vmem:[#allocation34_spill] sm:$0xff] }
 0x1fb   : > { %2987 = vmatmul.msk.bf16.gmra.mxu3 %vm806_vm4, %v3608_v25  ;;  %v3039_v25 = vld [vmem:[%s4301_s25] sm:$0xff]  }
 0x1fc   : > { %v3040_v9 = vunpack.c.l.bf16 %v3039_v25  ;;  %v3041_v48 = vunpack.c.h.bf16 %v3039_v25 }
 0x1fd   : > { %v2269_v24 = vpop.f32.mrf.mxu0 }
 0x1fe   : > { %v2129_v42 = vpop.f32.mrf.mxu3  ;;  %v1844_v1 = vpop.f32.mrf.mxu1 }
 0x1ff   : > { %v2209_v32 = vadd.f32 %v2129_v42, %v2053_v10  ;;  %v3102_v10 = vld [vmem:[%s4301_s25 + $0x8] sm:$0xff]  }
 0x200   : > { %3005 = vmatmul.msk.bf16.gmra.mxu0 %vm806_vm4, %v4010_v13 }
 0x201   : > { %v2349_v57 = vadd.f32 %v2269_v24, %v2209_v32  ;;  %v1975_v60 = vpop.f32.mrf.mxu2  ;;  %2950 = vmatmul.msk.bf16.gmra.mxu1 %vm806_vm4, %v4010_v13  ;;  %v1921_v13 = vadd.f32 %v1844_v1, %v4008_v21  ;;  %v4711_v1 = vld [vmem:[#allocation12_spill] sm:$0xff] }
 0x202   : > { %v2054_v43 = vadd.f32 %v1975_v60, %v1920_v38  ;;  %v3044_v38 = vunpack.c.l.bf16 %v3102_v10 }
 0x203   : > { %v2385_v41 = vmul.f32 %v4306_v12, %v2349_v57 }
 0x205   : > { %v2421_v37 = vadd.f32 %v4314_v27, %v2385_v41  ;;  %v2271_v17 = vpop.f32.mrf.mxu0 }
 0x206   : > { %v2131_v15 = vpop.f32.mrf.mxu3  ;;  %2971 = vmatmul.msk.bf16.gmra.mxu2 %vm806_vm4, %v4017_v50  ;;  %v1846_v44 = vpop.f32.mrf.mxu1 }
 0x207   : > { %v2517_v35 = vadd.f32 %v3040_v9, %v2421_v37  ;;  %v2210_v55 = vadd.f32 %v2131_v15, %v2054_v43  ;;  %v1922_v32 = vadd.f32 %v1846_v44, %v4711_v1  ;;  %v4712_v37 = vld [vmem:[#allocation35_spill] sm:$0xff]  ;;  %v4716_v1 = vld [vmem:[#allocation36_spill] sm:$0xff] }
 0x209   : > { %v2549_v33 = vmax.f32 %v2517_v35, 0.0  ;;  %v2350_v3 = vadd.f32 %v2271_v17, %v2210_v55  ;;  %v1978_v19 = vpop.f32.mrf.mxu2 }
 0x20a   : > { %v2055_v50 = vadd.f32 %v1978_v19, %v1921_v13 }
 0x20b   : > { %2581 = vst [vmem:[%s4327_s12] sm:$0xff] %v2549_v33  ;;  %v2386_v40 = vmul.f32 %v4306_v12, %v2350_v3  ;;  %2988 = vmatmul.msk.bf16.gmra.mxu3 %vm806_vm4, %v4709_v6  ;;  %v4713_v33 = vld [vmem:[#allocation33_spill] sm:$0xff] }
 0x20d   : > { %v2422_v39 = vadd.f32 %v4314_v27, %v2386_v40  ;;  %v2274_v18 = vpop.f32.mrf.mxu0  ;;  %v3045_v40 = vunpack.c.h.bf16 %v3102_v10 }
 0x20e   : > { %v2134_v4 = vpop.f32.mrf.mxu3  ;;  %v1849_v34 = vpop.f32.mrf.mxu1 }
 0x20f   : > { %v2518_v62 = vadd.f32 %v3041_v48, %v2422_v39  ;;  %v2211_v21 = vadd.f32 %v2134_v4, %v2055_v50  ;;  %v1923_v3 = vadd.f32 %v1849_v34, %v4713_v33  ;;  %v4714_v48 = vld [vmem:[#allocation6_spill] sm:$0xff]  ;;  %v3103_v34 = vld [vmem:[%s4301_s25 + $0x10] sm:$0xff]  }
 0x210   : > { %3006 = vmatmul.msk.bf16.gmra.mxu0 %vm806_vm4, %v4710_v45 }
 0x211   : > { %v2550_v24 = vmax.f32 %v2518_v62, 0.0  ;;  %v2351_v42 = vadd.f32 %v2274_v18, %v2211_v21  ;;  %v1980_v25 = vpop.f32.mrf.mxu2  ;;  %2951 = vmatmul.msk.bf16.gmra.mxu1 %vm806_vm4, %v4710_v45  ;;  %v4715_v45 = vld [vmem:[#allocation38_spill] sm:$0xff] }
 0x212   : > { %v2056_v60 = vadd.f32 %v1980_v25, %v1922_v32 }
 0x213   : > { %2582 = vst [vmem:[%s4327_s12 + $0x8] sm:$0xff] %v2550_v24  ;;  %v2387_v57 = vmul.f32 %v4306_v12, %v2351_v42 }
 0x215   : > { %v2423_v41 = vadd.f32 %v4314_v27, %v2387_v57  ;;  %v2276_v9 = vpop.f32.mrf.mxu0  ;;  %v3048_v57 = vunpack.c.l.bf16 %v3103_v34 }
 0x216   : > { %v2136_v43 = vpop.f32.mrf.mxu3  ;;  %2972 = vmatmul.msk.bf16.gmra.mxu2 %vm806_vm4, %v4712_v37  ;;  %v1851_v17 = vpop.f32.mrf.mxu1 }
 0x217   : > { %v2519_v15 = vadd.f32 %v3044_v38, %v2423_v41  ;;  %v2212_v44 = vadd.f32 %v2136_v43, %v2056_v60  ;;  %v1924_v10 = vadd.f32 %v1851_v17, %v4716_v1  ;;  %v4717_v43 = vld [vmem:[#allocation39_spill] sm:$0xff]  ;;  %v4721_v1 = vld [vmem:[#allocation40_spill] sm:$0xff] }
 0x219   : > { %v2551_v35 = vmax.f32 %v2519_v15, 0.0  ;;  %v2352_v55 = vadd.f32 %v2276_v9, %v2212_v44  ;;  %v1983_v13 = vpop.f32.mrf.mxu2 }
 0x21a   : > { %v2057_v6 = vadd.f32 %v1983_v13, %v1923_v3 }
 0x21b   : > { %2583 = vst [vmem:[%s4327_s12 + $0x10] sm:$0xff] %v2551_v35  ;;  %v2388_v19 = vmul.f32 %v4306_v12, %v2352_v55  ;;  %2989 = vmatmul.msk.bf16.gmra.mxu3 %vm806_vm4, %v4714_v48  ;;  %v4718_v55 = vld [vmem:[#allocation37_spill] sm:$0xff] }
 0x21d   : > { %v2424_v50 = vadd.f32 %v4314_v27, %v2388_v19  ;;  %v2279_v39 = vpop.f32.mrf.mxu0  ;;  %v3049_v19 = vunpack.c.h.bf16 %v3103_v34 }
 0x21e   : > { %v2139_v18 = vpop.f32.mrf.mxu3  ;;  %v1854_v4 = vpop.f32.mrf.mxu1 }
 0x21f   : > { %v2520_v62 = vadd.f32 %v3045_v40, %v2424_v50  ;;  %v2213_v21 = vadd.f32 %v2139_v18, %v2057_v6  ;;  %v1925_v33 = vadd.f32 %v1854_v4, %v4718_v55  ;;  %v4719_v40 = vld [vmem:[#allocation7_spill] sm:$0xff]  ;;  %v3104_v4 = vld [vmem:[%s4301_s25 + $0x18] sm:$0xff]  }
 0x220   : > { %3007 = vmatmul.msk.bf16.gmra.mxu0 %vm806_vm4, %v4715_v45 }
 0x221   : > { %v2552_v24 = vmax.f32 %v2520_v62, 0.0  ;;  %v2353_v42 = vadd.f32 %v2279_v39, %v2213_v21  ;;  %v1985_v32 = vpop.f32.mrf.mxu2  ;;  %2952 = vmatmul.msk.bf16.gmra.mxu1 %vm806_vm4, %v4715_v45  ;;  %v4720_v45 = vld [vmem:[#allocation42_spill] sm:$0xff] }
 0x222   : > { %v2058_v38 = vadd.f32 %v1985_v32, %v1924_v10 }
 0x223   : > { %2584 = vst [vmem:[%s4327_s12 + $0x18] sm:$0xff] %v2552_v24  ;;  %v2389_v25 = vmul.f32 %v4306_v12, %v2353_v42 }
 0x225   : > { %v2425_v60 = vadd.f32 %v4314_v27, %v2389_v25  ;;  %v2281_v41 = vpop.f32.mrf.mxu0  ;;  %v3052_v25 = vunpack.c.l.bf16 %v3104_v4 }
 0x226   : > { %v2141_v9 = vpop.f32.mrf.mxu3  ;;  %2973 = vmatmul.msk.bf16.gmra.mxu2 %vm806_vm4, %v4717_v43  ;;  %v1856_v37 = vpop.f32.mrf.mxu1 }
 0x227   : > { %v2521_v15 = vadd.f32 %v3048_v57, %v2425_v60  ;;  %v2214_v17 = vadd.f32 %v2141_v9, %v2058_v38  ;;  %v1926_v34 = vadd.f32 %v1856_v37, %v4721_v1  ;;  %v4722_v9 = vld [vmem:[#allocation9_spill] sm:$0xff]  ;;  %v4726_v1 = vld [vmem:[#allocation10_spill] sm:$0xff] }
 0x229   : > { %v2553_v44 = vmax.f32 %v2521_v15, 0.0  ;;  %v2354_v35 = vadd.f32 %v2281_v41, %v2214_v17  ;;  %v1988_v3 = vpop.f32.mrf.mxu2 }
 0x22a   : > { %v2059_v48 = vadd.f32 %v1988_v3, %v1925_v33 }
 0x22b   : > { %2585 = vst [vmem:[%s4327_s12 + $0x20] sm:$0xff] %v2553_v44  ;;  %v2390_v13 = vmul.f32 %v4306_v12, %v2354_v35  ;;  %2990 = vmatmul.msk.bf16.gmra.mxu3 %vm806_vm4, %v4719_v40  ;;  %v4723_v35 = vld [vmem:[#allocation41_spill] sm:$0xff] }
 0x22d   : > { %v2426_v6 = vadd.f32 %v4314_v27, %v2390_v13  ;;  %v2284_v50 = vpop.f32.mrf.mxu0  ;;  %v3053_v13 = vunpack.c.h.bf16 %v3104_v4 }
 0x22e   : > { %v2144_v39 = vpop.f32.mrf.mxu3  ;;  %v1859_v18 = vpop.f32.mrf.mxu1 }
 0x22f   : > { %v2522_v62 = vadd.f32 %v3049_v19, %v2426_v6  ;;  %v2215_v21 = vadd.f32 %v2144_v39, %v2059_v48  ;;  %v1927_v55 = vadd.f32 %v1859_v18, %v4723_v35  ;;  %v4724_v19 = vld [vmem:[#allocation13_spill] sm:$0xff] }
 0x230   : > { %3008 = vmatmul.msk.bf16.gmra.mxu0 %vm806_vm4, %v4720_v45  ;;  %v3105_v18 = vld [vmem:[%s4301_s25 + $0x20] sm:$0xff]  }
 0x231   : > { %v2554_v24 = vmax.f32 %v2522_v62, 0.0  ;;  %v2355_v42 = vadd.f32 %v2284_v50, %v2215_v21  ;;  %v1990_v10 = vpop.f32.mrf.mxu2  ;;  %2953 = vmatmul.msk.bf16.gmra.mxu1 %vm806_vm4, %v4720_v45  ;;  %v4725_v45 = vld [vmem:[#allocation44_spill] sm:$0xff] }
 0x232   : > { %v2060_v57 = vadd.f32 %v1990_v10, %v1926_v34 }
 0x233   : > { %2586 = vst [vmem:[%s4327_s12 + $0x28] sm:$0xff] %v2554_v24  ;;  %v2391_v32 = vmul.f32 %v4306_v12, %v2355_v42 }
 0x235   : > { %v2427_v38 = vadd.f32 %v4314_v27, %v2391_v32  ;;  %v2286_v60 = vpop.f32.mrf.mxu0  ;;  %v3056_v32 = vunpack.c.l.bf16 %v3105_v18 }
 0x236   : > { %v2146_v41 = vpop.f32.mrf.mxu3  ;;  %2974 = vmatmul.msk.bf16.gmra.mxu2 %vm806_vm4, %v4722_v9  ;;  %v1861_v43 = vpop.f32.mrf.mxu1 }
 0x237   : > { %v2523_v15 = vadd.f32 %v3052_v25, %v2427_v38  ;;  %v2216_v37 = vadd.f32 %v2146_v41, %v2060_v57  ;;  %v1928_v4 = vadd.f32 %v1861_v43, %v4726_v1 }
 0x239   : > { %v2555_v17 = vmax.f32 %v2523_v15, 0.0  ;;  %v2356_v44 = vadd.f32 %v2286_v60, %v2216_v37  ;;  %v1993_v33 = vpop.f32.mrf.mxu2 }
 0x23a   : > { %v2061_v40 = vadd.f32 %v1993_v33, %v1927_v55  ;;  %v3057_v33 = vunpack.c.h.bf16 %v3105_v18 }
 0x23b   : > { %2587 = vst [vmem:[%s4327_s12 + $0x30] sm:$0xff] %v2555_v17  ;;  %v2392_v3 = vmul.f32 %v4306_v12, %v2356_v44  ;;  %2991 = vmatmul.msk.bf16.gmra.mxu3 %vm806_vm4, %v4724_v19  ;;  %v4727_v17 = vld [vmem:[#allocation43_spill] sm:$0xff] }
 0x23d   : > { %v2428_v48 = vadd.f32 %v4314_v27, %v2392_v3  ;;  %v2289_v6 = vpop.f32.mrf.mxu0 }
 0x23e   : > { %v2149_v50 = vpop.f32.mrf.mxu3  ;;  %v1864_v39 = vpop.f32.mrf.mxu1 }
 0x23f   : > { %v2524_v62 = vadd.f32 %v3053_v13, %v2428_v48  ;;  %v2217_v21 = vadd.f32 %v2149_v50, %v2061_v40  ;;  %v1929_v44 = vadd.f32 %v1864_v39, %v4727_v17  ;;  %v4404_v48 = vld [vmem:[%s3385_s29 + $0xcc] sm:$0xf] }
 0x240   : > { %3009 = vmatmul.msk.bf16.gmra.mxu0 %vm806_vm4, %v4725_v45  ;;  %v2086_v1 = vshrl.u32 %v4404_v48, 16 }
 0x241   : > { %v2556_v24 = vmax.f32 %v2524_v62, 0.0  ;;  %v2357_v42 = vadd.f32 %v2289_v6, %v2217_v21  ;;  %v1995_v34 = vpop.f32.mrf.mxu2  ;;  %2954 = vmatmul.msk.bf16.gmra.mxu1 %vm806_vm4, %v4725_v45  ;;  %v4407_v6 = vld [vmem:[%s3385_s29 + $0xd0] sm:$0xf]  ;;  %v4729_v62 = vld [vmem:[#allocation8_spill] sm:$0xff] }
 0x242   : > { %v2062_v25 = vadd.f32 %v1995_v34, %v1928_v4  ;;  %v2939_v21 = vrot.slane %v4729_v62, 9  ;;  %v2089_v4 = vshll.u32 %v4404_v48, 16  ;;  %v2095_v34 = vshll.u32 %v4407_v6, 16 }
 0x243   : > { %2588 = vst [vmem:[%s4327_s12 + $0x38] sm:$0xff] %v2556_v24  ;;  %v2393_v10 = vmul.f32 %v4306_v12, %v2357_v42  ;;  %v3106_v24 = vld [vmem:[%s4301_s25 + $0x28] sm:$0xff]  }
 0x244   : > { %v2091_v17 = vrot.slane %v2089_v4, 5 }
 0x245   : > { %v2429_v57 = vadd.f32 %v4314_v27, %v2393_v10  ;;  %v2291_v38 = vpop.f32.mrf.mxu0  ;;  %v2099_v10 = vshrl.u32 %v4407_v6, 16 }
 0x246   : > { %v2151_v60 = vpop.f32.mrf.mxu3  ;;  %2975 = vmatmul.msk.bf16.gmra.mxu2 %vm806_vm4, %v4130_v30  ;;  %v1866_v41 = vpop.f32.mrf.mxu1  ;;  %v4728_v30 = vld [vmem:[#allocation45_spill] sm:$0xff] }
 0x247   : > { %v2525_v9 = vadd.f32 %v3056_v32, %v2429_v57  ;;  %v2218_v43 = vadd.f32 %v2151_v60, %v2062_v25  ;;  %v1814_v13 = vrot.slane %v4728_v30, 5  ;;  %v1930_v57 = vadd.f32 %v1866_v41, %v4134_v49 }
 0x249   : > { %v2557_v15 = vmax.f32 %v2525_v9, 0.0  ;;  %v2358_v37 = vadd.f32 %v2291_v38, %v2218_v43  ;;  %v1998_v35 = vpop.f32.mrf.mxu2  ;;  %v1816_v42 = vrot.slane %v1814_v13, 4  ;;  %v1815_v43 = vsel %vm3715_vm7, %v2939_v21, %v1814_v13 }
 0x24a   : > { %v2063_v3 = vadd.f32 %v1998_v35, %v1929_v44  ;;  %v2097_v44 = vrot.slane %v2095_v34, 5  ;;  %v2101_v35 = vrot.slane %v2099_v10, 4  ;;  %v1821_v13 = vunpack.c.l.b16 %v1815_v43 }
 0x24b   : > { %2589 = vst [vmem:[%s4327_s12 + $0x40] sm:$0xff] %v2557_v15  ;;  %v2394_v55 = vmul.f32 %v4306_v12, %v2358_v37  ;;  %2992 = vmatmul.msk.bf16.gmra.mxu3 %vm806_vm4, %v3724_v53  ;;  %v1817_v53 = vrot.slane %v4137_v11, 5  ;;  %v3060_v11 = vunpack.c.l.bf16 %v3106_v24  ;;  %v2088_v37 = vrot.slane %v2086_v1, 4 }
 0x24c   : > { %v3061_v1 = vunpack.c.h.bf16 %v3106_v24  ;;  %v3107_v24 = vld [vmem:[%s4301_s25 + $0x30] sm:$0xff]  }
 0x24d   : > { %v2430_v19 = vadd.f32 %v4314_v27, %v2394_v55  ;;  %v2294_v40 = vpop.f32.mrf.mxu0  ;;  %v1818_v15 = vsel %vm3715_vm7, %v1816_v42, %v1817_v53  ;;  %v3065_v14 = vunpack.c.h.bf16 %v3107_v24 }
 0x24e   : > { %v2154_v50 = vpop.f32.mrf.mxu3  ;;  %v1869_v39 = vpop.f32.mrf.mxu1 }
 0x24f   : > { %v2526_v45 = vadd.f32 %v3057_v33, %v2430_v19  ;;  %v2219_v18 = vadd.f32 %v2154_v50, %v2063_v3  ;;  %v1822_v19 = vunpack.c.l.b16 %v1818_v15  ;;  %v2102_v50 = vor.u32 %v2101_v35, %v2097_v44 }
 0x250   : > { %3010 = vmatmul.msk.bf16.gmra.mxu0 %vm806_vm4, %v4153_v46 }
 0x251   : > { %v2558_v32 = vmax.f32 %v2526_v45, 0.0  ;;  %v2359_v25 = vadd.f32 %v2294_v40, %v2219_v18  ;;  %v2000_v38 = vpop.f32.mrf.mxu2  ;;  %2955 = vmatmul.msk.bf16.gmra.mxu1 %vm806_vm4, %v4153_v46  ;;  %v367_v46 = vld [vmem:[%s3385_s29 + $0xd4] sm:$0x1]  ;;  %v2092_v40 = vor.u32 %v2091_v17, %v2088_v37  ;;  %v1931_v18 = vadd.f32 %v1869_v39, %v4151_v7 }
 0x252   : > { %v2064_v9 = vadd.f32 %v2000_v38, %v1930_v57  ;;  %v2105_v62 = vshll.u32 %v367_v46, 16  ;;  %v2103_v10 = vrot.slane %v2102_v50, 4 }
 0x253   : > { %2590 = vst [vmem:[%s4327_s12 + $0x48] sm:$0xff] %v2558_v32  ;;  %v2395_v60 = vmul.f32 %v4306_v12, %v2359_v25  ;;  %v2093_v34 = vrot.slane %v2092_v40, 4  ;;  %v2244_v25 = vrot.slane %v4407_v6, 5  ;;  %v2995_v6 = vrot.slane %v4404_v48, 9 }
 0x254   : > { %v2107_v32 = vrot.slane %v2105_v62, 5 }
 0x255   : > { %v2431_v49 = vadd.f32 %v4314_v27, %v2395_v60  ;;  %v2296_v41 = vpop.f32.mrf.mxu0  ;;  %v2246_v43 = vrot.slane %v2244_v25, 4 }
 0x256   : > { %v2156_v55 = vpop.f32.mrf.mxu3  ;;  %2976 = vmatmul.msk.bf16.gmra.mxu2 %vm806_vm4, %v4162_v54  ;;  %v1871_v33 = vpop.f32.mrf.mxu1  ;;  %v1823_v54 = vpack.c.b16 %v1822_v19, %v1821_v13  ;;  %v2245_v19 = vsel %vm3715_vm7, %v2995_v6, %v2244_v25 }
 0x257   : > { %v2527_v3 = vadd.f32 %v3060_v11, %v2431_v49  ;;  %v2220_v30 = vadd.f32 %v2156_v55, %v2064_v9  ;;  %v2108_v9 = vsel %vm3412_vm3, %v2103_v10, %v2107_v32  ;;  %v1932_v17 = vadd.f32 %v1871_v33, %v4165_v28  ;;  %v3036_v55 = vld [vmem:[%s3385_s29 + $0xcc] sm:$0xff] }
 0x258   : > { %v2247_v49 = vrot.slane %v367_v46, 5  ;;  %v2112_v36 = vunpack.c.l.b16 %v2108_v9 }
 0x259   : > { %v2559_v21 = vmax.f32 %v2527_v3, 0.0  ;;  %v2360_v45 = vadd.f32 %v2296_v41, %v2220_v30  ;;  %v2003_v42 = vpop.f32.mrf.mxu2  ;;  %v3064_v41 = vunpack.c.l.bf16 %v3107_v24 }
 0x25a   : > { %v2065_v4 = vadd.f32 %v2003_v42, %v1931_v18  ;;  %v2248_v28 = vsel %vm3715_vm7, %v2246_v43, %v2247_v49 }
 0x25b   : > { %2591 = vst [vmem:[%s4327_s12 + $0x50] sm:$0xff] %v2559_v21  ;;  %v2396_v53 = vmul.f32 %v4306_v12, %v2360_v45  ;;  %2993 = vmatmul.msk.bf16.gmra.mxu3 %vm806_vm4, %v4169_v22  ;;  %v2098_v22 = vsel %vm3412_vm3, %v2093_v34, %v2097_v44  ;;  %v2251_v21 = vunpack.c.l.b16 %v2245_v19  ;;  %v2252_v45 = vunpack.c.l.b16 %v2248_v28 }
 0x25c   : > { %v2111_v30 = vunpack.c.l.b16 %v2098_v22 }
 0x25d   : > { %v2432_v57 = vadd.f32 %v4314_v27, %v2396_v53  ;;  %v2299_v38 = vpop.f32.mrf.mxu0  ;;  %v2253_v34 = vpack.c.b16 %v2252_v45, %v2251_v21 }
 0x25e   : > { %v2159_v7 = vpop.f32.mrf.mxu3  ;;  %v1874_v39 = vpop.f32.mrf.mxu1  ;;  %v2113_v62 = vpack.c.b16 %v2112_v36, %v2111_v30 }
 0x25f   : > { %v2528_v11 = vadd.f32 %v3061_v1, %v2432_v57  ;;  %v2221_v60 = vadd.f32 %v2159_v7, %v2065_v4  ;;  %v1933_v53 = vadd.f32 %v1874_v39, %v4176_v58  ;;  %v3108_v58 = vld [vmem:[%s4301_s25 + $0x38] sm:$0xff]  }
 0x260   : > { %3011 = vmatmul.msk.bf16.gmra.mxu0 %vm806_vm4, %v1823_v54  ;;  %v3068_v9 = vunpack.c.l.bf16 %v3108_v58  ;;  %v3069_v30 = vunpack.c.h.bf16 %v3108_v58 }
 0x261   : > { %v2560_v15 = vmax.f32 %v2528_v11, 0.0  ;;  %v2361_v37 = vadd.f32 %v2299_v38, %v2221_v60  ;;  %v2005_v35 = vpop.f32.mrf.mxu2  ;;  %2956 = vmatmul.msk.bf16.gmra.mxu1 %vm806_vm4, %v1823_v54 }
 0x262   : > { %v2066_v44 = vadd.f32 %v2005_v35, %v1932_v17 }
 0x263   : > { %2592 = vst [vmem:[%s4327_s12 + $0x58] sm:$0xff] %v2560_v15  ;;  %v2397_v3 = vmul.f32 %v4306_v12, %v2361_v37 }
 0x265   : > { %v2433_v13 = vadd.f32 %v4314_v27, %v2397_v3  ;;  %v2301_v48 = vpop.f32.mrf.mxu0 }
 0x266   : > { %v2161_v33 = vpop.f32.mrf.mxu3  ;;  %2977 = vmatmul.msk.bf16.gmra.mxu2 %vm806_vm4, %v3036_v55  ;;  %v1876_v46 = vpop.f32.mrf.mxu1 }
 0x267   : > { %v2529_v40 = vadd.f32 %v3064_v41, %v2433_v13  ;;  %v2222_v50 = vadd.f32 %v2161_v33, %v2066_v44  ;;  %v1934_v60 = vadd.f32 %v1876_v46, %v4181_v31 }
 0x269   : > { %v2561_v18 = vmax.f32 %v2529_v40, 0.0  ;;  %v2362_v42 = vadd.f32 %v2301_v48, %v2222_v50  ;;  %v2008_v1 = vpop.f32.mrf.mxu2  ;;  %v3109_v40 = vld [vmem:[%s4301_s25 + $0x40] sm:$0xff]  }
 0x26a   : > { %v2067_v4 = vadd.f32 %v2008_v1, %v1933_v53 }
 0x26b   : > { %2593 = vst [vmem:[%s4327_s12 + $0x60] sm:$0xff] %v2561_v18  ;;  %v2398_v54 = vmul.f32 %v4306_v12, %v2362_v42  ;;  %2994 = vmatmul.msk.bf16.gmra.mxu3 %vm806_vm4, %v2113_v62  ;;  %v3072_v18 = vunpack.c.l.bf16 %v3109_v40 }
 0x26d   : > { %v2434_v10 = vadd.f32 %v4314_v27, %v2398_v54  ;;  %v2304_v32 = vpop.f32.mrf.mxu0 }
 0x26e   : > { %v2164_v25 = vpop.f32.mrf.mxu3  ;;  %v1879_v57 = vpop.f32.mrf.mxu1 }
 0x26f   : > { %v2530_v38 = vadd.f32 %v3065_v14, %v2434_v10  ;;  %v2223_v7 = vadd.f32 %v2164_v25, %v2067_v4  ;;  %v1935_v3 = vadd.f32 %v1879_v57, %v4190_v16 }
 0x270   : > { %3012 = vmatmul.msk.bf16.gmra.mxu0 %vm806_vm4, %v2253_v34 }
 0x271   : > { %v2562_v39 = vmax.f32 %v2530_v38, 0.0  ;;  %v2363_v11 = vadd.f32 %v2304_v32, %v2223_v7  ;;  %v2010_v24 = vpop.f32.mrf.mxu2  ;;  %v3073_v38 = vunpack.c.h.bf16 %v3109_v40 }
 0x272   : > { %v2068_v6 = vadd.f32 %v2010_v24, %v1934_v60 }
 0x273   : > { %2594 = vst [vmem:[%s4327_s12 + $0x68] sm:$0xff] %v2562_v39  ;;  %v2399_v22 = vmul.f32 %v4306_v12, %v2363_v11 }
 0x275   : > { %v2435_v43 = vadd.f32 %v4314_v27, %v2399_v22  ;;  %v2306_v15 = vpop.f32.mrf.mxu0 }
 0x276   : > { %v2166_v37 = vpop.f32.mrf.mxu3  ;;  %v1881_v17 = vpop.f32.mrf.mxu1 }
 0x277   : > { %v2531_v35 = vadd.f32 %v3068_v9, %v2435_v43  ;;  %v2224_v49 = vadd.f32 %v2166_v37, %v2068_v6  ;;  %v1936_v21 = vadd.f32 %v1881_v17, %v4195_v26  ;;  %v3110_v9 = vld [vmem:[%s4301_s25 + $0x48] sm:$0xff]  }
 0x278   : > { %v3076_v17 = vunpack.c.l.bf16 %v3110_v9 }
 0x279   : > { %v2563_v41 = vmax.f32 %v2531_v35, 0.0  ;;  %v2364_v55 = vadd.f32 %v2306_v15, %v2224_v49  ;;  %v2013_v31 = vpop.f32.mrf.mxu2 }
 0x27a   : > { %v2069_v36 = vadd.f32 %v2013_v31, %v1935_v3 }
 0x27b   : > { %2595 = vst [vmem:[%s4327_s12 + $0x70] sm:$0xff] %v2563_v41  ;;  %v2400_v44 = vmul.f32 %v4306_v12, %v2364_v55 }
 0x27d   : > { %v2436_v13 = vadd.f32 %v4314_v27, %v2400_v44  ;;  %v2309_v48 = vpop.f32.mrf.mxu0 }
 0x27e   : > { %v2169_v19 = vpop.f32.mrf.mxu3  ;;  %v1884_v28 = vpop.f32.mrf.mxu1 }
 0x27f   : > { %v2532_v33 = vadd.f32 %v3069_v30, %v2436_v13  ;;  %v2225_v46 = vadd.f32 %v2169_v19, %v2069_v36  ;;  %v1937_v25 = vadd.f32 %v1884_v28, %v4204_v59  ;;  %v3077_v19 = vunpack.c.h.bf16 %v3110_v9 }
 0x281   : > { %v2564_v50 = vmax.f32 %v2532_v33, 0.0  ;;  %v2365_v62 = vadd.f32 %v2309_v48, %v2225_v46  ;;  %v2015_v16 = vpop.f32.mrf.mxu2 }
 0x282   : > { %v2070_v42 = vadd.f32 %v2015_v16, %v1936_v21  ;;  %v3111_v16 = vld [vmem:[%s4301_s25 + $0x50] sm:$0xff]  }
 0x283   : > { %2596 = vst [vmem:[%s4327_s12 + $0x78] sm:$0xff] %v2564_v50  ;;  %v2401_v45 = vmul.f32 %v4306_v12, %v2365_v62 }
 0x285   : > { %v2437_v53 = vadd.f32 %v4314_v27, %v2401_v45  ;;  %v2311_v1 = vpop.f32.mrf.mxu0 }
 0x286   : > { %v2171_v54 = vpop.f32.mrf.mxu3  ;;  %v1886_v14 = vpop.f32.mrf.mxu1 }
 0x287   : > { %v2533_v4 = vadd.f32 %v3072_v18, %v2437_v53  ;;  %v2226_v34 = vadd.f32 %v2171_v54, %v2070_v42  ;;  %v1938_v15 = vadd.f32 %v1886_v14, %v4209_v47 }
 0x289   : > { %v2565_v10 = vmax.f32 %v2533_v4, 0.0  ;;  %v2366_v32 = vadd.f32 %v2311_v1, %v2226_v34  ;;  %v2018_v26 = vpop.f32.mrf.mxu2  ;;  %v3080_v1 = vunpack.c.l.bf16 %v3111_v16 }
 0x28a   : > { %v2071_v7 = vadd.f32 %v2018_v26, %v1937_v25 }
 0x28b   : > { %2597 = vst [vmem:[%s4327_s12 + $0x80] sm:$0xff] %v2565_v10  ;;  %v2402_v57 = vmul.f32 %v4306_v12, %v2366_v32 }
 0x28d   : > { %v2438_v58 = vadd.f32 %v4314_v27, %v2402_v57  ;;  %v2314_v39 = vpop.f32.mrf.mxu0 }
 0x28e   : > { %v2174_v11 = vpop.f32.mrf.mxu3  ;;  %v1889_v60 = vpop.f32.mrf.mxu1 }
 0x28f   : > { %v2534_v24 = vadd.f32 %v3073_v38, %v2438_v58  ;;  %v2227_v22 = vadd.f32 %v2174_v11, %v2071_v7  ;;  %v1939_v13 = vadd.f32 %v1889_v60, %v4218_v23  ;;  %v3081_v58 = vunpack.c.h.bf16 %v3111_v16  ;;  %v3113_v16 = vld [vmem:[%s4301_s25 + $0x60] sm:$0xff]  }
 0x291   : > { %v2566_v6 = vmax.f32 %v2534_v24, 0.0  ;;  %v2367_v43 = vadd.f32 %v2314_v39, %v2227_v22  ;;  %v2020_v59 = vpop.f32.mrf.mxu2 }
 0x292   : > { %v2072_v35 = vadd.f32 %v2020_v59, %v1938_v15 }
 0x293   : > { %2598 = vst [vmem:[%s4327_s12 + $0x88] sm:$0xff] %v2566_v6  ;;  %v2403_v37 = vmul.f32 %v4306_v12, %v2367_v43  ;;  %v3112_v43 = vld [vmem:[%s4301_s25 + $0x58] sm:$0xff]  }
 0x295   : > { %v2439_v49 = vadd.f32 %v4314_v27, %v2403_v37  ;;  %v2316_v41 = vpop.f32.mrf.mxu0 }
 0x296   : > { %v2176_v55 = vpop.f32.mrf.mxu3  ;;  %v1891_v3 = vpop.f32.mrf.mxu1 }
 0x297   : > { %v2535_v31 = vadd.f32 %v3076_v17, %v2439_v49  ;;  %v2228_v44 = vadd.f32 %v2176_v55, %v2072_v35  ;;  %v1940_v42 = vadd.f32 %v1891_v3, %v4223_v61  ;;  %v3084_v35 = vunpack.c.l.bf16 %v3112_v43 }
 0x299   : > { %v2567_v30 = vmax.f32 %v2535_v31, 0.0  ;;  %v2368_v36 = vadd.f32 %v2316_v41, %v2228_v44  ;;  %v2023_v47 = vpop.f32.mrf.mxu2 }
 0x29a   : > { %v2073_v28 = vadd.f32 %v2023_v47, %v1939_v13 }
 0x29b   : > { %2599 = vst [vmem:[%s4327_s12 + $0x90] sm:$0xff] %v2567_v30  ;;  %v2404_v48 = vmul.f32 %v4306_v12, %v2368_v36 }
 0x29d   : > { %v2440_v33 = vadd.f32 %v4314_v27, %v2404_v48  ;;  %v2319_v46 = vpop.f32.mrf.mxu0 }
 0x29e   : > { %v2179_v40 = vpop.f32.mrf.mxu3  ;;  %v1894_v50 = vpop.f32.mrf.mxu1 }
 0x29f   : > { %v2536_v62 = vadd.f32 %v3077_v19, %v2440_v33  ;;  %v2229_v21 = vadd.f32 %v2179_v40, %v2073_v28  ;;  %v1941_v38 = vadd.f32 %v1894_v50, %v4232_v56  ;;  %v3085_v19 = vunpack.c.h.bf16 %v3112_v43 }
 0x2a1   : > { %v2568_v45 = vmax.f32 %v2536_v62, 0.0  ;;  %v2369_v18 = vadd.f32 %v2319_v46, %v2229_v21  ;;  %v2025_v23 = vpop.f32.mrf.mxu2 }
 0x2a2   : > { %v2074_v54 = vadd.f32 %v2025_v23, %v1940_v42 }
 0x2a3   : > { %2600 = vst [vmem:[%s4327_s12 + $0x98] sm:$0xff] %v2568_v45  ;;  %v2405_v53 = vmul.f32 %v4306_v12, %v2369_v18 }
 0x2a5   : > { %v2441_v14 = vadd.f32 %v4314_v27, %v2405_v53  ;;  %v2321_v4 = vpop.f32.mrf.mxu0  ;;  %v3088_v53 = vunpack.c.l.bf16 %v3113_v16 }
 0x2a6   : > { %v2181_v34 = vpop.f32.mrf.mxu3  ;;  %v1896_v10 = vpop.f32.mrf.mxu1 }
 0x2a7   : > { %v2537_v32 = vadd.f32 %v3080_v1, %v2441_v14  ;;  %v2230_v25 = vadd.f32 %v2181_v34, %v2074_v54  ;;  %v1942_v37 = vadd.f32 %v1896_v10, %v4237_v0 }
 0x2a9   : > { %v2569_v26 = vmax.f32 %v2537_v32, 0.0  ;;  %v2370_v57 = vadd.f32 %v2321_v4, %v2230_v25  ;;  %v2028_v61 = vpop.f32.mrf.mxu2 }
 0x2aa   : > { %v2075_v39 = vadd.f32 %v2028_v61, %v1941_v38  ;;  %v3089_v61 = vunpack.c.h.bf16 %v3113_v16 }
 0x2ab   : > { %2601 = vst [vmem:[%s4327_s12 + $0xa0] sm:$0xff] %v2569_v26  ;;  %v2406_v7 = vmul.f32 %v4306_v12, %v2370_v57 }
 0x2ad   : > { %v2442_v11 = vadd.f32 %v4314_v27, %v2406_v7  ;;  %v2324_v60 = vpop.f32.mrf.mxu0 }
 0x2ae   : > { %v2184_v24 = vpop.f32.mrf.mxu3  ;;  %v1899_v22 = vpop.f32.mrf.mxu1 }
 0x2af   : > { %v2538_v9 = vadd.f32 %v3081_v58, %v2442_v11  ;;  %v2231_v6 = vadd.f32 %v2184_v24, %v2075_v39  ;;  %v1943_v47 = vadd.f32 %v1899_v22, %v4246_v29 }
 0x2b1   : > { %v2570_v15 = vmax.f32 %v2538_v9, 0.0  ;;  %v2371_v59 = vadd.f32 %v2324_v60, %v2231_v6  ;;  %v2030_v56 = vpop.f32.mrf.mxu2  ;;  %v3114_v9 = vld [vmem:[%s4301_s25 + $0x68] sm:$0xff]  }
 0x2b2   : > { %v2076_v49 = vadd.f32 %v2030_v56, %v1942_v37  ;;  %v3092_v37 = vunpack.c.l.bf16 %v3114_v9 }
 0x2b3   : > { %2602 = vst [vmem:[%s4327_s12 + $0xa8] sm:$0xff] %v2570_v15  ;;  %v2407_v17 = vmul.f32 %v4306_v12, %v2371_v59 }
 0x2b5   : > { %v2443_v41 = vadd.f32 %v4314_v27, %v2407_v17  ;;  %v2326_v55 = vpop.f32.mrf.mxu0 }
 0x2b6   : > { %v2186_v3 = vpop.f32.mrf.mxu3  ;;  %v1901_v31 = vpop.f32.mrf.mxu1 }
 0x2b7   : > { %v2539_v44 = vadd.f32 %v3084_v35, %v2443_v41  ;;  %v2232_v30 = vadd.f32 %v2186_v3, %v2076_v49  ;;  %v1944_v42 = vadd.f32 %v1901_v31, %v4251_v52 }
 0x2b9   : > { %v2571_v36 = vmax.f32 %v2539_v44, 0.0  ;;  %v2372_v13 = vadd.f32 %v2326_v55, %v2232_v30  ;;  %v2033_v0 = vpop.f32.mrf.mxu2 }
 0x2ba   : > { %v2077_v28 = vadd.f32 %v2033_v0, %v1943_v47 }
 0x2bb   : > { %2603 = vst [vmem:[%s4327_s12 + $0xb0] sm:$0xff] %v2571_v36  ;;  %v2408_v48 = vmul.f32 %v4306_v12, %v2372_v13  ;;  %v3093_v13 = vunpack.c.h.bf16 %v3114_v9 }
 0x2bd   : > { %v2444_v33 = vadd.f32 %v4314_v27, %v2408_v48  ;;  %v2329_v46 = vpop.f32.mrf.mxu0 }
 0x2be   : > { %v2189_v40 = vpop.f32.mrf.mxu3  ;;  %v1904_v50 = vpop.f32.mrf.mxu1 }
 0x2bf   : > { %v2540_v62 = vadd.f32 %v3085_v19, %v2444_v33  ;;  %v2233_v21 = vadd.f32 %v2189_v40, %v2077_v28  ;;  %v1945_v57 = vadd.f32 %v1904_v50, %v4260_v20 }
 0x2c1   : > { %v2572_v45 = vmax.f32 %v2540_v62, 0.0  ;;  %v2373_v18 = vadd.f32 %v2329_v46, %v2233_v21  ;;  %v2035_v29 = vpop.f32.mrf.mxu2  ;;  %v3115_v46 = vld [vmem:[%s4301_s25 + $0x70] sm:$0xff]  }
 0x2c2   : > { %v2078_v1 = vadd.f32 %v2035_v29, %v1944_v42  ;;  %v3096_v16 = vunpack.c.l.bf16 %v3115_v46 }
 0x2c3   : > { %2604 = vst [vmem:[%s4327_s12 + $0xb8] sm:$0xff] %v2572_v45  ;;  %v2409_v23 = vmul.f32 %v4306_v12, %v2373_v18 }
 0x2c5   : > { %v2445_v54 = vadd.f32 %v4314_v27, %v2409_v23  ;;  %v2331_v14 = vpop.f32.mrf.mxu0 }
 0x2c6   : > { %v2191_v4 = vpop.f32.mrf.mxu3  ;;  %v1906_v34 = vpop.f32.mrf.mxu1 }
 0x2c7   : > { %v2541_v10 = vadd.f32 %v3088_v53, %v2445_v54  ;;  %v2234_v32 = vadd.f32 %v2191_v4, %v2078_v1  ;;  %v1946_v15 = vadd.f32 %v1906_v34, %v4265_v8 }
 0x2c9   : > { %v2573_v25 = vmax.f32 %v2541_v10, 0.0  ;;  %v2374_v26 = vadd.f32 %v2331_v14, %v2234_v32  ;;  %v2038_v52 = vpop.f32.mrf.mxu2  ;;  %v3097_v10 = vunpack.c.h.bf16 %v3115_v46 }
 0x2ca   : > { %v2079_v7 = vadd.f32 %v2038_v52, %v1945_v57 }
 0x2cb   : > { %2605 = vst [vmem:[%s4327_s12 + $0xc0] sm:$0xff] %v2573_v25  ;;  %v2410_v38 = vmul.f32 %v4306_v12, %v2374_v26 }
 0x2cd   : > { %v2446_v58 = vadd.f32 %v4314_v27, %v2410_v38  ;;  %v2334_v39 = vpop.f32.mrf.mxu0 }
 0x2ce   : > { %v2194_v11 = vpop.f32.mrf.mxu3  ;;  %v1909_v22 = vpop.f32.mrf.mxu1 }
 0x2cf   : > { %v2542_v60 = vadd.f32 %v3089_v61, %v2446_v58  ;;  %v2235_v24 = vadd.f32 %v2194_v11, %v2079_v7  ;;  %v1947_v44 = vadd.f32 %v1909_v22, %v4274_v51  ;;  %v3116_v7 = vld [vmem:[%s4301_s25 + $0x78] sm:$0xff]   ;;  %v3189_v22 = vld [vmem:[%s4587_s3] ss:$0 sm:$0xff]  ;;  %s2626_s25 = scalar_lea.hbm %s4589_s5, %s3037_s16 }
 0x2d0   : > { %s2629_s7 = sshll.u32 %s2626_s25, 4  ;;  %s2630_s7 = int_to_ptr.hbm [resolvable:$true] %s2629_s7 }
 0x2d1   : > { %v2574_v6 = vmax.f32 %v2542_v60, 0.0  ;;  %v2375_v43 = vadd.f32 %v2334_v39, %v2235_v24  ;;  %v2040_v20 = vpop.f32.mrf.mxu2  ;;  %s3204_s11 = sshra.s32 %s2630_s7, 4  ;;  %s3205_s11 = int_to_ptr.hbm [resolvable:$true] %s3204_s11 }
 0x2d2   : > { %v2080_v56 = vadd.f32 %v2040_v20, %v1946_v15  ;;  %s3206_s8 = scalar_lea.hbm %s3205_s11, 256  ;;  %p3211_p1 = scmp.lt.s32.totalorder %s3205_s11, %s4589_s5 }
 0x2d3   : > { %2606 = vst [vmem:[%s4327_s12 + $0xc8] sm:$0xff] %v2574_v6  ;;  %v2411_v59 = vmul.f32 %v4306_v12, %v2375_v43  ;;  %p3207_p12 = scmp.ne.s32.totalorder %s3205_s11, %s3206_s8  ;;  %p3212_p2 = scmp.lt.s32.totalorder %s3210_s13, %s3206_s8 }
 0x2d5   : > { %v2447_v17 = vadd.f32 %v4314_v27, %v2411_v59  ;;  %v2336_v35 = vpop.f32.mrf.mxu0  ;;  %p3208_p13 = pnand %p3207_p12, %p3342_p4  ;;  %p3213_p3 = por %p3212_p2, %p3211_p1 }
 0x2d6   : > { %v2196_v49 = vpop.f32.mrf.mxu3  ;;  %v1911_v8 = vpop.f32.mrf.mxu1 }
 0x2d7   : > { %v2543_v41 = vadd.f32 %v3092_v37, %v2447_v17  ;;  %v2236_v55 = vadd.f32 %v2196_v49, %v2080_v56  ;;  %v1948_v62 = vadd.f32 %v1911_v8, %v4279_v63  ;;  %v3101_v56 = vunpack.c.h.bf16 %v3116_v7  ;;  %p3209_p0 = pneg %p3208_p13 }
 0x2d9   : > { %v2575_v3 = vmax.f32 %v2543_v41, 0.0  ;;  %v2376_v31 = vadd.f32 %v2336_v35, %v2236_v55  ;;  %v2043_v30 = vpop.f32.mrf.mxu2  ;;  %p3214_p5 = pnand %p3213_p3, %p3209_p0 }
 0x2da   : > { %v2081_v47 = vadd.f32 %v2043_v30, %v1947_v44 }
 0x2db   : > { %2607 = vst [vmem:[%s4327_s12 + $0xd0] sm:$0xff] %v2575_v3  ;;  %v2412_v36 = vmul.f32 %v4306_v12, %v2376_v31 }
 0x2dd   : > { %v2448_v0 = vadd.f32 %v4314_v27, %v2412_v36  ;;  %v2339_v48 = vpop.f32.mrf.mxu0 }
 0x2de   : > { %v2199_v19 = vpop.f32.mrf.mxu3  ;;  %v1914_v18 = vpop.f32.mrf.mxu1 }
 0x2df   : > { %v2544_v28 = vadd.f32 %v3093_v13, %v2448_v0  ;;  %v2237_v33 = vadd.f32 %v2199_v19, %v2081_v47  ;;  %v1949_v4 = vadd.f32 %v1914_v18, %v4288_v2 }
 0x2e1   : > { %v2576_v40 = vmax.f32 %v2544_v28, 0.0  ;;  %v2377_v50 = vadd.f32 %v2339_v48, %v2237_v33  ;;  %v2045_v51 = vpop.f32.mrf.mxu2 }
 0x2e2   : > { %v2082_v45 = vadd.f32 %v2045_v51, %v1948_v62 }
 0x2e3   : > { %2608 = vst [vmem:[%s4327_s12 + $0xd8] sm:$0xff] %v2576_v40  ;;  %v2413_v21 = vmul.f32 %v4306_v12, %v2377_v50 }
 0x2e5   : > { %v2449_v42 = vadd.f32 %v4314_v27, %v2413_v21  ;;  %v2341_v29 = vpop.f32.mrf.mxu0 }
 0x2e6   : > { %v2201_v23 = vpop.f32.mrf.mxu3  ;;  %v1916_v26 = vpop.f32.mrf.mxu1 }
 0x2e7   : > { %v2545_v53 = vadd.f32 %v3096_v16, %v2449_v42  ;;  %v2238_v1 = vadd.f32 %v2201_v23, %v2082_v45  ;;  %v1950_v2 = vadd.f32 %v1916_v26, %v4293_v5 }
 0x2e9   : > { %v2577_v54 = vmax.f32 %v2545_v53, 0.0  ;;  %v2378_v14 = vadd.f32 %v2341_v29, %v2238_v1  ;;  %v2048_v63 = vpop.f32.mrf.mxu2 }
 0x2ea   : > { %v2083_v32 = vadd.f32 %v2048_v63, %v1949_v4 }
 0x2eb   : > { %2609 = vst [vmem:[%s4327_s12 + $0xe0] sm:$0xff] %v2577_v54  ;;  %v2414_v34 = vmul.f32 %v4306_v12, %v2378_v14  ;;  %v3188_v12 = vld [vmem:[%s4586_s2] ss:$0 sm:$0xff] }
 0x2ed   : > { %v2450_v25 = vadd.f32 %v4314_v27, %v2414_v34  ;;  %v2344_v57 = vpop.f32.mrf.mxu0  ;;  %v3100_v27 = vunpack.c.l.bf16 %v3116_v7 }
 0x2ee   : > { %v2204_v52 = vpop.f32.mrf.mxu3 }
 0x2ef   : > { %v2546_v38 = vadd.f32 %v3097_v10, %v2450_v25  ;;  %v2239_v61 = vadd.f32 %v2204_v52, %v2083_v32 }
 0x2f1   : > { %v2578_v58 = vmax.f32 %v2546_v38, 0.0  ;;  %v2379_v39 = vadd.f32 %v2344_v57, %v2239_v61  ;;  %v2050_v11 = vpop.f32.mrf.mxu2 }
 0x2f2   : > { %v2084_v24 = vadd.f32 %v2050_v11, %v1950_v2 }
 0x2f3   : > { %2610 = vst [vmem:[%s4327_s12 + $0xe8] sm:$0xff] %v2578_v58  ;;  %v2415_v60 = vmul.f32 %v3188_v12, %v2379_v39 }
 0x2f5   : > { %v2451_v9 = vadd.f32 %v3189_v22, %v2415_v60  ;;  %v2346_v5 = vpop.f32.mrf.mxu0 }
 0x2f6   : > { %v2206_v6 = vpop.f32.mrf.mxu3 }
 0x2f7   : > { %v2547_v43 = vadd.f32 %v3100_v27, %v2451_v9  ;;  %v2240_v15 = vadd.f32 %v2206_v6, %v2084_v24 }
 0x2f9   : > { %v2579_v20 = vmax.f32 %v2547_v43, 0.0  ;;  %v2380_v59 = vadd.f32 %v2346_v5, %v2240_v15 }
 0x2fb   : > { %2611 = vst [vmem:[%s4327_s12 + $0xf0] sm:$0xff] %v2579_v20  ;;  %v2416_v37 = vmul.f32 %v3188_v12, %v2380_v59 }
 0x2fd   : > { %v2452_v17 = vadd.f32 %v3189_v22, %v2416_v37 }
 0x2ff   : > { %v2548_v35 = vadd.f32 %v3101_v56, %v2452_v17 }
 0x301   : > { %v2580_v49 = vmax.f32 %v2548_v35, 0.0 }
 0x303   : > { %2612 = vst [vmem:[%s4327_s12 + $0xf8] sm:$0xff] %v2580_v49 }
 0x304   : > { %3217 = shalt.err (!%p3214_p5)
}
 0x305   : > { %s3270_s9 = smov 128   ;;  %s3271_s12 = smov 8  }
 0x306   : > { %3121 = dma.vmem_to_hbm [thread:$0]  (%p3342_p4), %s2628_s27, 4096, %s2630_s7, %s2614_s21, %s3270_s9, %s3270_s9, %s3271_s12  }
 0x307 PF: > { %p3127_p6 = scmp.ge.s32.totalorder %s3268_s23, 2  ;;  %s2644_s16 = sand.u32 1, %s3248_s18  }
 0x308   : > { %s2645_s17 = scalar_lea.sflag [#allocation3], %s2644_s16 }
 0x309   : > { %p3124_p7 = pnand %p3127_p6, %p3349_p8 }
 0x30b   : > { %p3125_p9 = pneg %p3124_p7 }
 0x30d   : > { %3243 = dma.done.wait (%p3125_p9), %s2645_s17, 4096  }
 0x30e   : > { %3245 = vsyncadd (%p3125_p9), %s2645_s17, 4294963200  ;;  %s18_s23 = sadd.s32 1, %s3268_s23   ;;  %s4730_s18 = smov %s3252_s19 }
 0x30f   : > { %p15_p10 = scmp.ge.s32.totalorder %s18_s23, 4   ;;  %s4731_s19 = smov %s3256_s20 }
 0x310   : > { %s4732_s20 = smov %s3355_s6  ;;  %s4733_s21 = smov %s3264_s22 }
 0x311   : > { %s4734_s22 = smov %s4736_s26  ;;  %17 = sbr.rel (!%p15_p10) target bundleno = 4 (0x4), region = 95 }
 0x316   :  { %2651 = vsyncpa [#allocation3], 1 }
 0x317   :  { %2653 = vsyncpa [#allocation3 + $0x1], 1 }

</bundles_post_ra>
